<compile_context>
chip_gen: v7x
topology: tpu7x:2x2x1
jax: 0.10.0
libtpu: 0.0.40
codegen_flags: <defaults>
</compile_context>

<pallas_src>
import math
import warnings

import jax
import jax.numpy as jnp
from jax import lax
from jax.experimental import pallas as pl
from jax.experimental.pallas import tpu as pltpu

LOW_MODEL_CAPACITY_WARNING = (
    "input_size is larger than lstm_hidden_size; model capacity may be low.")

_HIGHEST = jax.lax.Precision.HIGHEST   # same precision recipe in kernel and reference


# --------------------------------------------------------------------------- kernel

def _make_lstm_kernel(T, Tt, H, needs_mask):
    """Build the single-layer LSTM kernel (PyTorch gate order i | f | g | o).

    Per grid step (one time chunk of Tt steps):
      * one (B*Tt, I) x (I, 4H) f32 MXU matmul projects the streamed x chunk (off the
        serial path) and the bias is folded in,
      * a fully-unrolled serial loop runs the recurrence with one small (B,H)x(H,4H)
        matmul per step,
      * h/c live in the resident h_n / c_n output blocks (constant index_map), so the
        state persists across grid steps with no extra scratch.
    """
    G = 4 * H

    def kernel(x_ref, wih_ref, whh_ref, bias_ref, y_ref, hn_ref, cn_ref):
        # x_ref   : [B, Tt, I]  streamed input chunk (double-buffered by the pipeline)
        # wih_ref : [I, 4H]     resident W_ih^T
        # whh_ref : [H, 4H]     resident W_hh^T
        # bias_ref: [1, 4H]     resident (b_ih + b_hh)
        # y_ref   : [B, Tt, H]  streamed output chunk (batch-first layout, no transposes)
        # hn_ref, cn_ref : [B, H] resident output blocks doubling as the h/c state.
        @pl.when(pl.program_id(0) == 0)
        def _init():
            hn_ref[...] = jnp.zeros_like(hn_ref)
            cn_ref[...] = jnp.zeros_like(cn_ref)

        w_ih = wih_ref[...]
        w_hh = whh_ref[...]
        bias = bias_ref[...]                          # [1, 4H]

        x_chunk = x_ref[...].astype(jnp.float32)      # [B, Tt, I]
        B = x_chunk.shape[0]

        # Chunk-wide input projection: one big MXU matmul outside the serial recurrence.
        xp = jnp.dot(x_chunk.reshape(B * Tt, -1), w_ih,
                     preferred_element_type=jnp.float32, precision=_HIGHEST)
        xp = xp.reshape(B, Tt, G) + bias[:, None, :]  # [B, Tt, 4H]

        t0 = pl.program_id(0) * Tt
        h = hn_ref[...]
        c = cn_ref[...]
        # Fully-unrolled serial recurrence: static slices everywhere, only the small
        # h @ W_hh^T matmul sits on the serial dependency chain.
        for s in range(Tt):
            gates = xp[:, s, :] + jnp.dot(h, w_hh,
                                          preferred_element_type=jnp.float32,
                                          precision=_HIGHEST)          # [B, 4H]
            i_g = jax.nn.sigmoid(gates[:, 0 * H:1 * H])
            f_g = jax.nn.sigmoid(gates[:, 1 * H:2 * H])
            g_g = jnp.tanh(gates[:, 2 * H:3 * H])
            o_g = jax.nn.sigmoid(gates[:, 3 * H:4 * H])
            c_new = f_g * c + i_g * g_g
            h_new = o_g * jnp.tanh(c_new)
            if needs_mask:
                valid = (t0 + s) < T        # ragged last chunk: freeze the state past T
                h = jnp.where(valid, h_new, h)
                c = jnp.where(valid, c_new, c)
            else:
                h, c = h_new, c_new
            # Out-of-bounds rows of the last (ragged) block are clipped by the pipeline.
            y_ref[:, s, :] = h_new.astype(y_ref.dtype)

        hn_ref[...] = h
        cn_ref[...] = c

    return kernel


# --------------------------------------------------------------------------- wrapper

def _choose_time_chunk(T, max_chunk=None):
    """Whole sequence when short, otherwise a multiple of 8 (sublane-tiled block dim)."""
    cap = 16 if max_chunk is None else max(1, int(max_chunk))
    if T <= cap:
        return T
    return max(8, (cap // 8) * 8)


def lstm_layer_pallas(x, w_ih_t, w_hh_t, bias, *, time_chunk=None):
    """One unidirectional LSTM layer with zero initial state.

    x: [B, T, I] (batch_first). Returns (y [B, T, H], h_n [B, H], c_n [B, H]) in float32.
    """
    B, T, I = x.shape
    H = w_hh_t.shape[0]
    G = 4 * H
    Tt = _choose_time_chunk(T, time_chunk)
    grid = (pl.cdiv(T, Tt),)
    needs_mask = (T % Tt) != 0

    kernel = _make_lstm_kernel(T, Tt, H, needs_mask)
    out_shape = (
        jax.ShapeDtypeStruct((B, T, H), jnp.float32),
        jax.ShapeDtypeStruct((B, H), jnp.float32),
        jax.ShapeDtypeStruct((B, H), jnp.float32),
    )
    grid_spec = pltpu.PrefetchScalarGridSpec(
        num_scalar_prefetch=0,
        grid=grid,
        in_specs=[
            pl.BlockSpec((B, Tt, I), lambda t: (0, t, 0)),   # streamed x chunk
            pl.BlockSpec((I, G), lambda t: (0, 0)),          # resident W_ih^T
            pl.BlockSpec((H, G), lambda t: (0, 0)),          # resident W_hh^T
            pl.BlockSpec((1, G), lambda t: (0, 0)),          # resident bias
        ],
        out_specs=[
            pl.BlockSpec((B, Tt, H), lambda t: (0, t, 0)),   # y chunk, batch-first
            pl.BlockSpec((B, H), lambda t: (0, 0)),          # resident h state / h_n
            pl.BlockSpec((B, H), lambda t: (0, 0)),          # resident c state / c_n
        ],
    )
    return pl.pallas_call(
        kernel,
        out_shape=out_shape,
        grid_spec=grid_spec,
        compiler_params=pltpu.CompilerParams(
            dimension_semantics=("arbitrary",),   # sequential state carry over time
        ),
    )(x, w_ih_t, w_hh_t, bias.reshape(1, G))


class UserLSTMPallas:
    """Pallas port of UserLSTM: one LSTM (stack) per user id (MultiTask heads)."""

    def __init__(self, users, input_size, lstm_hidden_size, num_layers=1,
                 bidirectional=False, dropout=0.0, seed=0, time_chunk=None):
        self.input_size = input_size
        self.lstm_hidden_size = lstm_hidden_size
        self.num_layers = num_layers
        self.bidirectional = bidirectional
        self.dropout = dropout            # TODO(synk): inter-layer dropout not applied (eval mode).
        self.time_chunk = time_chunk
        if bidirectional:
            # TODO(synk): bidirectional path (hidden//2, reverse pass + concat) not implemented.
            raise NotImplementedError("bidirectional UserLSTM not implemented in the Pallas port")
        if self.input_size > self.lstm_hidden_size:
            warnings.warn(LOW_MODEL_CAPACITY_WARNING)

        H = self.lstm_hidden_size
        k = 1.0 / math.sqrt(H)   # PyTorch nn.LSTM default init: U(-1/sqrt(H), 1/sqrt(H))
        key = jax.random.PRNGKey(seed)
        self.params = {}
        for u_idx, user in enumerate(users):
            layers = []
            for layer in range(num_layers):
                in_sz = input_size if layer == 0 else H
                kk = jax.random.fold_in(jax.random.fold_in(key, u_idx), layer)
                k1, k2, k3, k4 = jax.random.split(kk, 4)
                w_ih = jax.random.uniform(k1, (4 * H, in_sz), jnp.float32, -k, k)
                w_hh = jax.random.uniform(k2, (4 * H, H), jnp.float32, -k, k)
                b_ih = jax.random.uniform(k3, (4 * H,), jnp.float32, -k, k)
                b_hh = jax.random.uniform(k4, (4 * H,), jnp.float32, -k, k)
                layers.append(dict(
                    w_ih_t=w_ih.T,          # [in, 4H] f32, resident in VMEM during the kernel
                    w_hh_t=w_hh.T,          # [H, 4H]  f32, resident
                    bias=(b_ih + b_hh),     # [4H]     f32, folded into the chunk projection
                ))
            self.params[user] = layers

    def __call__(self, user, input_data):
        """input_data: [B, T, input_size] (batch_first, like the PyTorch module).

        Returns (output [B, T, H], (h_n [num_layers, B, H], c_n [num_layers, B, H])) in
        float32, matching nn.LSTM(batch_first=True) semantics for the unidirectional case.
        """
        x = input_data
        h_all, c_all = [], []
        for layer_p in self.params[user]:
            y, h_n, c_n = lstm_layer_pallas(
                x, layer_p["w_ih_t"], layer_p["w_hh_t"], layer_p["bias"],
                time_chunk=self.time_chunk)
            x = y                 # activations stay batch-first [B, T, H]; no transposes
            h_all.append(h_n)
            c_all.append(c_n)
        return x, (jnp.stack(h_all, axis=0), jnp.stack(c_all, axis=0))


# --------------------------------------------------------------------------- reference

def _lstm_layer_reference(x, w_ih_t, w_hh_t, bias):
    """Pure-JAX lax.scan reference for one layer (f32 throughout, same precision recipe)."""
    B, T, I = x.shape
    H = w_hh_t.shape[0]
    xp = jnp.einsum("bti,ig->tbg", x.astype(jnp.float32), w_ih_t,
                    precision=_HIGHEST) + bias

    def step(carry, xp_t):
        h, c = carry
        gates = xp_t + jnp.dot(h, w_hh_t, precision=_HIGHEST)
        i = jax.nn.sigmoid(gates[:, 0 * H:1 * H])
        f = jax.nn.sigmoid(gates[:, 1 * H:2 * H])
        g = jnp.tanh(gates[:, 2 * H:3 * H])
        o = jax.nn.sigmoid(gates[:, 3 * H:4 * H])
        c_new = f * c + i * g
        h_new = o * jnp.tanh(c_new)
        return (h_new, c_new), h_new

    init = (jnp.zeros((B, H), jnp.float32), jnp.zeros((B, H), jnp.float32))
    (h_n, c_n), ys = lax.scan(step, init, xp)
    return jnp.transpose(ys, (1, 0, 2)), h_n, c_n


# --------------------------------------------------------------------------- demo / check

if __name__ == "__main__":
    users = ["student_0", "student_1"]
    B, T, I, H = 2, 16, 16, 32

    # time_chunk=8 with T=16 -> grid of 2 chunks: exercises the pipelined time grid and
    # the cross-chunk h/c state carry in the resident output blocks.
    model = UserLSTMPallas(users, input_size=I, lstm_hidden_size=H,
                           num_layers=1, time_chunk=8)

    key = jax.random.PRNGKey(0)
    x = jax.random.normal(key, (B, T, I), jnp.float32)

    out, (h_n, c_n) = model("student_1", x)
    out, h_n, c_n = jax.block_until_ready((out, h_n, c_n))

    p = model.params["student_1"][0]
    ref_y, ref_h, ref_c = _lstm_layer_reference(x, p["w_ih_t"], p["w_hh_t"], p["bias"])
    assert out.shape == (B, T, H) and h_n.shape == (1, B, H) and c_n.shape == (1, B, H)
    assert jnp.allclose(out, ref_y, atol=1e-3, rtol=1e-3)
    assert jnp.allclose(h_n[0], ref_h, atol=1e-3, rtol=1e-3)
    assert jnp.allclose(c_n[0], ref_c, atol=1e-3, rtol=1e-3)

    # Ragged time axis (T=13 not divisible by the chunk of 8): exercises the masked
    # last-chunk path that replaced the old Tt=1 fallback.
    T2 = 13
    x2 = jax.random.normal(jax.random.fold_in(key, 1), (B, T2, I), jnp.float32)
    out2, (h2, c2) = model("student_0", x2)
    out2, h2, c2 = jax.block_until_ready((out2, h2, c2))
    p0 = model.params["student_0"][0]
    ref_y2, ref_h2, ref_c2 = _lstm_layer_reference(x2, p0["w_ih_t"], p0["w_hh_t"], p0["bias"])
    assert out2.shape == (B, T2, H)
    assert jnp.allclose(out2, ref_y2, atol=1e-3, rtol=1e-3)
    assert jnp.allclose(h2[0], ref_h2, atol=1e-3, rtol=1e-3)
    assert jnp.allclose(c2[0], ref_c2, atol=1e-3, rtol=1e-3)

    print("KERNEL_OK")
</pallas_src>

<mosaic_0001>
module attributes {stable_mosaic.version = 11 : i64} {
  func.func @kernel(%arg0: i32, %arg1: memref<2x8x16xf32, #tpu.memory_space<vmem>>, %arg2: memref<16x128xf32, #tpu.memory_space<vmem>>, %arg3: memref<32x128xf32, #tpu.memory_space<vmem>>, %arg4: memref<1x128xf32, #tpu.memory_space<vmem>>, %arg5: memref<2x8x32xf32, #tpu.memory_space<vmem>>, %arg6: memref<2x32xf32, #tpu.memory_space<vmem>>, %arg7: memref<2x32xf32, #tpu.memory_space<vmem>>) attributes {dimension_semantics = [#tpu.dimension_semantics<arbitrary>], iteration_bounds = array<i64: 2>, scalar_prefetch = 0 : i64, scratch_operands = 0 : i64, tpu.core_type = #tpu.core_type<tc>, window_params = [{transform_indices = @transform_0, window_bounds = array<i64: 2, 8, 16>}, {pipeline_mode = #tpu.pipeline_mode<synchronous>, transform_indices = @transform_1, window_bounds = array<i64: 16, 128>}, {pipeline_mode = #tpu.pipeline_mode<synchronous>, transform_indices = @transform_2, window_bounds = array<i64: 32, 128>}, {pipeline_mode = #tpu.pipeline_mode<synchronous>, transform_indices = @transform_3, window_bounds = array<i64: 1, 128>}, {transform_indices = @transform_4, window_bounds = array<i64: 2, 8, 32>}, {pipeline_mode = #tpu.pipeline_mode<synchronous>, transform_indices = @transform_5, window_bounds = array<i64: 2, 32>}, {pipeline_mode = #tpu.pipeline_mode<synchronous>, transform_indices = @transform_6, window_bounds = array<i64: 2, 32>}]} {
    %c0_i32 = arith.constant 0 : i32
    %0 = arith.cmpi eq, %arg0, %c0_i32 : i32
    %1 = arith.extui %0 : i1 to i32
    %c0_i32_0 = arith.constant 0 : i32
    %2 = arith.cmpi ne, %1, %c0_i32_0 : i32
    scf.if %2 {
      %cst_66 = arith.constant 0.000000e+00 : f32
      %273 = vector.broadcast %cst_66 : f32 to vector<2x32xf32>
      %c0_67 = arith.constant 0 : index
      %c0_68 = arith.constant 0 : index
      %274 = vector.load %arg6[%c0_67, %c0_68] : memref<2x32xf32, #tpu.memory_space<vmem>>, vector<2x32xf32>
      tpu.vector_store %arg6[%c0_67, %c0_68], %273 {strides = array<i32>} : memref<2x32xf32, #tpu.memory_space<vmem>>, vector<2x32xf32>,
      %cst_69 = arith.constant 0.000000e+00 : f32
      %275 = vector.broadcast %cst_69 : f32 to vector<2x32xf32>
      %c0_70 = arith.constant 0 : index
      %c0_71 = arith.constant 0 : index
      %276 = vector.load %arg7[%c0_70, %c0_71] : memref<2x32xf32, #tpu.memory_space<vmem>>, vector<2x32xf32>
      tpu.vector_store %arg7[%c0_70, %c0_71], %275 {strides = array<i32>} : memref<2x32xf32, #tpu.memory_space<vmem>>, vector<2x32xf32>,
    } else {
    }
    %c0 = arith.constant 0 : index
    %c0_1 = arith.constant 0 : index
    %3 = vector.load %arg2[%c0, %c0_1] : memref<16x128xf32, #tpu.memory_space<vmem>>, vector<16x128xf32>
    %c0_2 = arith.constant 0 : index
    %c0_3 = arith.constant 0 : index
    %4 = vector.load %arg3[%c0_2, %c0_3] : memref<32x128xf32, #tpu.memory_space<vmem>>, vector<32x128xf32>
    %c0_4 = arith.constant 0 : index
    %c0_5 = arith.constant 0 : index
    %5 = vector.load %arg4[%c0_4, %c0_5] : memref<1x128xf32, #tpu.memory_space<vmem>>, vector<1x128xf32>
    %c0_6 = arith.constant 0 : index
    %c0_7 = arith.constant 0 : index
    %c0_8 = arith.constant 0 : index
    %6 = vector.load %arg1[%c0_6, %c0_7, %c0_8] : memref<2x8x16xf32, #tpu.memory_space<vmem>>, vector<2x8x16xf32>
    %7 = vector.shape_cast %6 : vector<2x8x16xf32> to vector<16x16xf32>
    %cst = arith.constant dense<0.000000e+00> : vector<16x128xf32>
    %8 = tpu.matmul %7, %3, %cst {dimension_numbers = #tpu.dot_dimension_numbers<[1], [0], [0], [1], [0, 0, 1, 1], [], []>, precision = #tpu.contract_precision<fp32>} : vector<16x16xf32>, vector<16x128xf32>, vector<16x128xf32> -> vector<16x128xf32>
    %9 = vector.shape_cast %8 : vector<16x128xf32> to vector<2x8x128xf32>
    %10 = vector.shape_cast %5 : vector<1x128xf32> to vector<1x1x128xf32>
    %11 = vector.broadcast %10 : vector<1x1x128xf32> to vector<2x8x128xf32>
    %12 = arith.addf %9, %11 : vector<2x8x128xf32>
    %c0_9 = arith.constant 0 : index
    %c0_10 = arith.constant 0 : index
    %13 = vector.load %arg6[%c0_9, %c0_10] : memref<2x32xf32, #tpu.memory_space<vmem>>, vector<2x32xf32>
    %c0_11 = arith.constant 0 : index
    %c0_12 = arith.constant 0 : index
    %14 = vector.load %arg7[%c0_11, %c0_12] : memref<2x32xf32, #tpu.memory_space<vmem>>, vector<2x32xf32>
    %15 = vector.extract_strided_slice %12 {offsets = [0, 0, 0], sizes = [2, 1, 128], strides = [1, 1, 1]} : vector<2x8x128xf32> to vector<2x1x128xf32>
    %16 = vector.shape_cast %15 : vector<2x1x128xf32> to vector<2x128xf32>
    %cst_13 = arith.constant dense<0.000000e+00> : vector<2x128xf32>
    %17 = tpu.matmul %13, %4, %cst_13 {dimension_numbers = #tpu.dot_dimension_numbers<[1], [0], [0], [1], [0, 0, 1, 1], [], []>, precision = #tpu.contract_precision<fp32>} : vector<2x32xf32>, vector<32x128xf32>, vector<2x128xf32> -> vector<2x128xf32>
    %18 = arith.addf %16, %17 : vector<2x128xf32>
    %19 = vector.extract_strided_slice %18 {offsets = [0, 0], sizes = [2, 32], strides = [1, 1]} : vector<2x128xf32> to vector<2x32xf32>
    %20 = arith.negf %19 : vector<2x32xf32>
    %21 = math.exp %20 : vector<2x32xf32>
    %cst_14 = arith.constant 1.000000e+00 : f32
    %22 = vector.broadcast %cst_14 : f32 to vector<2x32xf32>
    %23 = arith.addf %22, %21 : vector<2x32xf32>
    %24 = arith.divf %22, %23 : vector<2x32xf32>
    %25 = vector.extract_strided_slice %18 {offsets = [0, 32], sizes = [2, 32], strides = [1, 1]} : vector<2x128xf32> to vector<2x32xf32>
    %26 = arith.negf %25 : vector<2x32xf32>
    %27 = math.exp %26 : vector<2x32xf32>
    %cst_15 = arith.constant 1.000000e+00 : f32
    %28 = vector.broadcast %cst_15 : f32 to vector<2x32xf32>
    %29 = arith.addf %28, %27 : vector<2x32xf32>
    %30 = arith.divf %28, %29 : vector<2x32xf32>
    %31 = vector.extract_strided_slice %18 {offsets = [0, 64], sizes = [2, 32], strides = [1, 1]} : vector<2x128xf32> to vector<2x32xf32>
    %32 = math.tanh %31 : vector<2x32xf32>
    %33 = vector.extract_strided_slice %18 {offsets = [0, 96], sizes = [2, 32], strides = [1, 1]} : vector<2x128xf32> to vector<2x32xf32>
    %34 = arith.negf %33 : vector<2x32xf32>
    %35 = math.exp %34 : vector<2x32xf32>
    %cst_16 = arith.constant 1.000000e+00 : f32
    %36 = vector.broadcast %cst_16 : f32 to vector<2x32xf32>
    %37 = arith.addf %36, %35 : vector<2x32xf32>
    %38 = arith.divf %36, %37 : vector<2x32xf32>
    %39 = arith.mulf %30, %14 : vector<2x32xf32>
    %40 = arith.mulf %24, %32 : vector<2x32xf32>
    %41 = arith.addf %39, %40 : vector<2x32xf32>
    %42 = math.tanh %41 : vector<2x32xf32>
    %43 = arith.mulf %38, %42 : vector<2x32xf32>
    %c0_17 = arith.constant 0 : index
    %c0_18 = arith.constant 0 : index
    %c0_19 = arith.constant 0 : index
    %44 = vector.load %arg5[%c0_17, %c0_18, %c0_19] : memref<2x8x32xf32, #tpu.memory_space<vmem>>, vector<2x1x32xf32>
    %45 = vector.shape_cast %44 : vector<2x1x32xf32> to vector<2x32xf32>
    %46 = vector.shape_cast %43 : vector<2x32xf32> to vector<2x1x32xf32>
    tpu.vector_store %arg5[%c0_17, %c0_18, %c0_19], %46 {strides = array<i32>} : memref<2x8x32xf32, #tpu.memory_space<vmem>>, vector<2x1x32xf32>,
    %47 = vector.extract_strided_slice %12 {offsets = [0, 1, 0], sizes = [2, 1, 128], strides = [1, 1, 1]} : vector<2x8x128xf32> to vector<2x1x128xf32>
    %48 = vector.shape_cast %47 : vector<2x1x128xf32> to vector<2x128xf32>
    %cst_20 = arith.constant dense<0.000000e+00> : vector<2x128xf32>
    %49 = tpu.matmul %43, %4, %cst_20 {dimension_numbers = #tpu.dot_dimension_numbers<[1], [0], [0], [1], [0, 0, 1, 1], [], []>, precision = #tpu.contract_precision<fp32>} : vector<2x32xf32>, vector<32x128xf32>, vector<2x128xf32> -> vector<2x128xf32>
    %50 = arith.addf %48, %49 : vector<2x128xf32>
    %51 = vector.extract_strided_slice %50 {offsets = [0, 0], sizes = [2, 32], strides = [1, 1]} : vector<2x128xf32> to vector<2x32xf32>
    %52 = arith.negf %51 : vector<2x32xf32>
    %53 = math.exp %52 : vector<2x32xf32>
    %cst_21 = arith.constant 1.000000e+00 : f32
    %54 = vector.broadcast %cst_21 : f32 to vector<2x32xf32>
    %55 = arith.addf %54, %53 : vector<2x32xf32>
    %56 = arith.divf %54, %55 : vector<2x32xf32>
    %57 = vector.extract_strided_slice %50 {offsets = [0, 32], sizes = [2, 32], strides = [1, 1]} : vector<2x128xf32> to vector<2x32xf32>
    %58 = arith.negf %57 : vector<2x32xf32>
    %59 = math.exp %58 : vector<2x32xf32>
    %cst_22 = arith.constant 1.000000e+00 : f32
    %60 = vector.broadcast %cst_22 : f32 to vector<2x32xf32>
    %61 = arith.addf %60, %59 : vector<2x32xf32>
    %62 = arith.divf %60, %61 : vector<2x32xf32>
    %63 = vector.extract_strided_slice %50 {offsets = [0, 64], sizes = [2, 32], strides = [1, 1]} : vector<2x128xf32> to vector<2x32xf32>
    %64 = math.tanh %63 : vector<2x32xf32>
    %65 = vector.extract_strided_slice %50 {offsets = [0, 96], sizes = [2, 32], strides = [1, 1]} : vector<2x128xf32> to vector<2x32xf32>
    %66 = arith.negf %65 : vector<2x32xf32>
    %67 = math.exp %66 : vector<2x32xf32>
    %cst_23 = arith.constant 1.000000e+00 : f32
    %68 = vector.broadcast %cst_23 : f32 to vector<2x32xf32>
    %69 = arith.addf %68, %67 : vector<2x32xf32>
    %70 = arith.divf %68, %69 : vector<2x32xf32>
    %71 = arith.mulf %62, %41 : vector<2x32xf32>
    %72 = arith.mulf %56, %64 : vector<2x32xf32>
    %73 = arith.addf %71, %72 : vector<2x32xf32>
    %74 = math.tanh %73 : vector<2x32xf32>
    %75 = arith.mulf %70, %74 : vector<2x32xf32>
    %c0_24 = arith.constant 0 : index
    %c1 = arith.constant 1 : index
    %c0_25 = arith.constant 0 : index
    %76 = vector.load %arg5[%c0_24, %c1, %c0_25] : memref<2x8x32xf32, #tpu.memory_space<vmem>>, vector<2x1x32xf32>
    %77 = vector.shape_cast %76 : vector<2x1x32xf32> to vector<2x32xf32>
    %78 = vector.shape_cast %75 : vector<2x32xf32> to vector<2x1x32xf32>
    tpu.vector_store %arg5[%c0_24, %c1, %c0_25], %78 {strides = array<i32>} : memref<2x8x32xf32, #tpu.memory_space<vmem>>, vector<2x1x32xf32>,
    %79 = vector.extract_strided_slice %12 {offsets = [0, 2, 0], sizes = [2, 1, 128], strides = [1, 1, 1]} : vector<2x8x128xf32> to vector<2x1x128xf32>
    %80 = vector.shape_cast %79 : vector<2x1x128xf32> to vector<2x128xf32>
    %cst_26 = arith.constant dense<0.000000e+00> : vector<2x128xf32>
    %81 = tpu.matmul %75, %4, %cst_26 {dimension_numbers = #tpu.dot_dimension_numbers<[1], [0], [0], [1], [0, 0, 1, 1], [], []>, precision = #tpu.contract_precision<fp32>} : vector<2x32xf32>, vector<32x128xf32>, vector<2x128xf32> -> vector<2x128xf32>
    %82 = arith.addf %80, %81 : vector<2x128xf32>
    %83 = vector.extract_strided_slice %82 {offsets = [0, 0], sizes = [2, 32], strides = [1, 1]} : vector<2x128xf32> to vector<2x32xf32>
    %84 = arith.negf %83 : vector<2x32xf32>
    %85 = math.exp %84 : vector<2x32xf32>
    %cst_27 = arith.constant 1.000000e+00 : f32
    %86 = vector.broadcast %cst_27 : f32 to vector<2x32xf32>
    %87 = arith.addf %86, %85 : vector<2x32xf32>
    %88 = arith.divf %86, %87 : vector<2x32xf32>
    %89 = vector.extract_strided_slice %82 {offsets = [0, 32], sizes = [2, 32], strides = [1, 1]} : vector<2x128xf32> to vector<2x32xf32>
    %90 = arith.negf %89 : vector<2x32xf32>
    %91 = math.exp %90 : vector<2x32xf32>
    %cst_28 = arith.constant 1.000000e+00 : f32
    %92 = vector.broadcast %cst_28 : f32 to vector<2x32xf32>
    %93 = arith.addf %92, %91 : vector<2x32xf32>
    %94 = arith.divf %92, %93 : vector<2x32xf32>
    %95 = vector.extract_strided_slice %82 {offsets = [0, 64], sizes = [2, 32], strides = [1, 1]} : vector<2x128xf32> to vector<2x32xf32>
    %96 = math.tanh %95 : vector<2x32xf32>
    %97 = vector.extract_strided_slice %82 {offsets = [0, 96], sizes = [2, 32], strides = [1, 1]} : vector<2x128xf32> to vector<2x32xf32>
    %98 = arith.negf %97 : vector<2x32xf32>
    %99 = math.exp %98 : vector<2x32xf32>
    %cst_29 = arith.constant 1.000000e+00 : f32
    %100 = vector.broadcast %cst_29 : f32 to vector<2x32xf32>
    %101 = arith.addf %100, %99 : vector<2x32xf32>
    %102 = arith.divf %100, %101 : vector<2x32xf32>
    %103 = arith.mulf %94, %73 : vector<2x32xf32>
    %104 = arith.mulf %88, %96 : vector<2x32xf32>
    %105 = arith.addf %103, %104 : vector<2x32xf32>
    %106 = math.tanh %105 : vector<2x32xf32>
    %107 = arith.mulf %102, %106 : vector<2x32xf32>
    %c0_30 = arith.constant 0 : index
    %c2 = arith.constant 2 : index
    %c0_31 = arith.constant 0 : index
    %108 = vector.load %arg5[%c0_30, %c2, %c0_31] : memref<2x8x32xf32, #tpu.memory_space<vmem>>, vector<2x1x32xf32>
    %109 = vector.shape_cast %108 : vector<2x1x32xf32> to vector<2x32xf32>
    %110 = vector.shape_cast %107 : vector<2x32xf32> to vector<2x1x32xf32>
    tpu.vector_store %arg5[%c0_30, %c2, %c0_31], %110 {strides = array<i32>} : memref<2x8x32xf32, #tpu.memory_space<vmem>>, vector<2x1x32xf32>,
    %111 = vector.extract_strided_slice %12 {offsets = [0, 3, 0], sizes = [2, 1, 128], strides = [1, 1, 1]} : vector<2x8x128xf32> to vector<2x1x128xf32>
    %112 = vector.shape_cast %111 : vector<2x1x128xf32> to vector<2x128xf32>
    %cst_32 = arith.constant dense<0.000000e+00> : vector<2x128xf32>
    %113 = tpu.matmul %107, %4, %cst_32 {dimension_numbers = #tpu.dot_dimension_numbers<[1], [0], [0], [1], [0, 0, 1, 1], [], []>, precision = #tpu.contract_precision<fp32>} : vector<2x32xf32>, vector<32x128xf32>, vector<2x128xf32> -> vector<2x128xf32>
    %114 = arith.addf %112, %113 : vector<2x128xf32>
    %115 = vector.extract_strided_slice %114 {offsets = [0, 0], sizes = [2, 32], strides = [1, 1]} : vector<2x128xf32> to vector<2x32xf32>
    %116 = arith.negf %115 : vector<2x32xf32>
    %117 = math.exp %116 : vector<2x32xf32>
    %cst_33 = arith.constant 1.000000e+00 : f32
    %118 = vector.broadcast %cst_33 : f32 to vector<2x32xf32>
    %119 = arith.addf %118, %117 : vector<2x32xf32>
    %120 = arith.divf %118, %119 : vector<2x32xf32>
    %121 = vector.extract_strided_slice %114 {offsets = [0, 32], sizes = [2, 32], strides = [1, 1]} : vector<2x128xf32> to vector<2x32xf32>
    %122 = arith.negf %121 : vector<2x32xf32>
    %123 = math.exp %122 : vector<2x32xf32>
    %cst_34 = arith.constant 1.000000e+00 : f32
    %124 = vector.broadcast %cst_34 : f32 to vector<2x32xf32>
    %125 = arith.addf %124, %123 : vector<2x32xf32>
    %126 = arith.divf %124, %125 : vector<2x32xf32>
    %127 = vector.extract_strided_slice %114 {offsets = [0, 64], sizes = [2, 32], strides = [1, 1]} : vector<2x128xf32> to vector<2x32xf32>
    %128 = math.tanh %127 : vector<2x32xf32>
    %129 = vector.extract_strided_slice %114 {offsets = [0, 96], sizes = [2, 32], strides = [1, 1]} : vector<2x128xf32> to vector<2x32xf32>
    %130 = arith.negf %129 : vector<2x32xf32>
    %131 = math.exp %130 : vector<2x32xf32>
    %cst_35 = arith.constant 1.000000e+00 : f32
    %132 = vector.broadcast %cst_35 : f32 to vector<2x32xf32>
    %133 = arith.addf %132, %131 : vector<2x32xf32>
    %134 = arith.divf %132, %133 : vector<2x32xf32>
    %135 = arith.mulf %126, %105 : vector<2x32xf32>
    %136 = arith.mulf %120, %128 : vector<2x32xf32>
    %137 = arith.addf %135, %136 : vector<2x32xf32>
    %138 = math.tanh %137 : vector<2x32xf32>
    %139 = arith.mulf %134, %138 : vector<2x32xf32>
    %c0_36 = arith.constant 0 : index
    %c3 = arith.constant 3 : index
    %c0_37 = arith.constant 0 : index
    %140 = vector.load %arg5[%c0_36, %c3, %c0_37] : memref<2x8x32xf32, #tpu.memory_space<vmem>>, vector<2x1x32xf32>
    %141 = vector.shape_cast %140 : vector<2x1x32xf32> to vector<2x32xf32>
    %142 = vector.shape_cast %139 : vector<2x32xf32> to vector<2x1x32xf32>
    tpu.vector_store %arg5[%c0_36, %c3, %c0_37], %142 {strides = array<i32>} : memref<2x8x32xf32, #tpu.memory_space<vmem>>, vector<2x1x32xf32>,
    %143 = vector.extract_strided_slice %12 {offsets = [0, 4, 0], sizes = [2, 1, 128], strides = [1, 1, 1]} : vector<2x8x128xf32> to vector<2x1x128xf32>
    %144 = vector.shape_cast %143 : vector<2x1x128xf32> to vector<2x128xf32>
    %cst_38 = arith.constant dense<0.000000e+00> : vector<2x128xf32>
    %145 = tpu.matmul %139, %4, %cst_38 {dimension_numbers = #tpu.dot_dimension_numbers<[1], [0], [0], [1], [0, 0, 1, 1], [], []>, precision = #tpu.contract_precision<fp32>} : vector<2x32xf32>, vector<32x128xf32>, vector<2x128xf32> -> vector<2x128xf32>
    %146 = arith.addf %144, %145 : vector<2x128xf32>
    %147 = vector.extract_strided_slice %146 {offsets = [0, 0], sizes = [2, 32], strides = [1, 1]} : vector<2x128xf32> to vector<2x32xf32>
    %148 = arith.negf %147 : vector<2x32xf32>
    %149 = math.exp %148 : vector<2x32xf32>
    %cst_39 = arith.constant 1.000000e+00 : f32
    %150 = vector.broadcast %cst_39 : f32 to vector<2x32xf32>
    %151 = arith.addf %150, %149 : vector<2x32xf32>
    %152 = arith.divf %150, %151 : vector<2x32xf32>
    %153 = vector.extract_strided_slice %146 {offsets = [0, 32], sizes = [2, 32], strides = [1, 1]} : vector<2x128xf32> to vector<2x32xf32>
    %154 = arith.negf %153 : vector<2x32xf32>
    %155 = math.exp %154 : vector<2x32xf32>
    %cst_40 = arith.constant 1.000000e+00 : f32
    %156 = vector.broadcast %cst_40 : f32 to vector<2x32xf32>
    %157 = arith.addf %156, %155 : vector<2x32xf32>
    %158 = arith.divf %156, %157 : vector<2x32xf32>
    %159 = vector.extract_strided_slice %146 {offsets = [0, 64], sizes = [2, 32], strides = [1, 1]} : vector<2x128xf32> to vector<2x32xf32>
    %160 = math.tanh %159 : vector<2x32xf32>
    %161 = vector.extract_strided_slice %146 {offsets = [0, 96], sizes = [2, 32], strides = [1, 1]} : vector<2x128xf32> to vector<2x32xf32>
    %162 = arith.negf %161 : vector<2x32xf32>
    %163 = math.exp %162 : vector<2x32xf32>
    %cst_41 = arith.constant 1.000000e+00 : f32
    %164 = vector.broadcast %cst_41 : f32 to vector<2x32xf32>
    %165 = arith.addf %164, %163 : vector<2x32xf32>
    %166 = arith.divf %164, %165 : vector<2x32xf32>
    %167 = arith.mulf %158, %137 : vector<2x32xf32>
    %168 = arith.mulf %152, %160 : vector<2x32xf32>
    %169 = arith.addf %167, %168 : vector<2x32xf32>
    %170 = math.tanh %169 : vector<2x32xf32>
    %171 = arith.mulf %166, %170 : vector<2x32xf32>
    %c0_42 = arith.constant 0 : index
    %c4 = arith.constant 4 : index
    %c0_43 = arith.constant 0 : index
    %172 = vector.load %arg5[%c0_42, %c4, %c0_43] : memref<2x8x32xf32, #tpu.memory_space<vmem>>, vector<2x1x32xf32>
    %173 = vector.shape_cast %172 : vector<2x1x32xf32> to vector<2x32xf32>
    %174 = vector.shape_cast %171 : vector<2x32xf32> to vector<2x1x32xf32>
    tpu.vector_store %arg5[%c0_42, %c4, %c0_43], %174 {strides = array<i32>} : memref<2x8x32xf32, #tpu.memory_space<vmem>>, vector<2x1x32xf32>,
    %175 = vector.extract_strided_slice %12 {offsets = [0, 5, 0], sizes = [2, 1, 128], strides = [1, 1, 1]} : vector<2x8x128xf32> to vector<2x1x128xf32>
    %176 = vector.shape_cast %175 : vector<2x1x128xf32> to vector<2x128xf32>
    %cst_44 = arith.constant dense<0.000000e+00> : vector<2x128xf32>
    %177 = tpu.matmul %171, %4, %cst_44 {dimension_numbers = #tpu.dot_dimension_numbers<[1], [0], [0], [1], [0, 0, 1, 1], [], []>, precision = #tpu.contract_precision<fp32>} : vector<2x32xf32>, vector<32x128xf32>, vector<2x128xf32> -> vector<2x128xf32>
    %178 = arith.addf %176, %177 : vector<2x128xf32>
    %179 = vector.extract_strided_slice %178 {offsets = [0, 0], sizes = [2, 32], strides = [1, 1]} : vector<2x128xf32> to vector<2x32xf32>
    %180 = arith.negf %179 : vector<2x32xf32>
    %181 = math.exp %180 : vector<2x32xf32>
    %cst_45 = arith.constant 1.000000e+00 : f32
    %182 = vector.broadcast %cst_45 : f32 to vector<2x32xf32>
    %183 = arith.addf %182, %181 : vector<2x32xf32>
    %184 = arith.divf %182, %183 : vector<2x32xf32>
    %185 = vector.extract_strided_slice %178 {offsets = [0, 32], sizes = [2, 32], strides = [1, 1]} : vector<2x128xf32> to vector<2x32xf32>
    %186 = arith.negf %185 : vector<2x32xf32>
    %187 = math.exp %186 : vector<2x32xf32>
    %cst_46 = arith.constant 1.000000e+00 : f32
    %188 = vector.broadcast %cst_46 : f32 to vector<2x32xf32>
    %189 = arith.addf %188, %187 : vector<2x32xf32>
    %190 = arith.divf %188, %189 : vector<2x32xf32>
    %191 = vector.extract_strided_slice %178 {offsets = [0, 64], sizes = [2, 32], strides = [1, 1]} : vector<2x128xf32> to vector<2x32xf32>
    %192 = math.tanh %191 : vector<2x32xf32>
    %193 = vector.extract_strided_slice %178 {offsets = [0, 96], sizes = [2, 32], strides = [1, 1]} : vector<2x128xf32> to vector<2x32xf32>
    %194 = arith.negf %193 : vector<2x32xf32>
    %195 = math.exp %194 : vector<2x32xf32>
    %cst_47 = arith.constant 1.000000e+00 : f32
    %196 = vector.broadcast %cst_47 : f32 to vector<2x32xf32>
    %197 = arith.addf %196, %195 : vector<2x32xf32>
    %198 = arith.divf %196, %197 : vector<2x32xf32>
    %199 = arith.mulf %190, %169 : vector<2x32xf32>
    %200 = arith.mulf %184, %192 : vector<2x32xf32>
    %201 = arith.addf %199, %200 : vector<2x32xf32>
    %202 = math.tanh %201 : vector<2x32xf32>
    %203 = arith.mulf %198, %202 : vector<2x32xf32>
    %c0_48 = arith.constant 0 : index
    %c5 = arith.constant 5 : index
    %c0_49 = arith.constant 0 : index
    %204 = vector.load %arg5[%c0_48, %c5, %c0_49] : memref<2x8x32xf32, #tpu.memory_space<vmem>>, vector<2x1x32xf32>
    %205 = vector.shape_cast %204 : vector<2x1x32xf32> to vector<2x32xf32>
    %206 = vector.shape_cast %203 : vector<2x32xf32> to vector<2x1x32xf32>
    tpu.vector_store %arg5[%c0_48, %c5, %c0_49], %206 {strides = array<i32>} : memref<2x8x32xf32, #tpu.memory_space<vmem>>, vector<2x1x32xf32>,
    %207 = vector.extract_strided_slice %12 {offsets = [0, 6, 0], sizes = [2, 1, 128], strides = [1, 1, 1]} : vector<2x8x128xf32> to vector<2x1x128xf32>
    %208 = vector.shape_cast %207 : vector<2x1x128xf32> to vector<2x128xf32>
    %cst_50 = arith.constant dense<0.000000e+00> : vector<2x128xf32>
    %209 = tpu.matmul %203, %4, %cst_50 {dimension_numbers = #tpu.dot_dimension_numbers<[1], [0], [0], [1], [0, 0, 1, 1], [], []>, precision = #tpu.contract_precision<fp32>} : vector<2x32xf32>, vector<32x128xf32>, vector<2x128xf32> -> vector<2x128xf32>
    %210 = arith.addf %208, %209 : vector<2x128xf32>
    %211 = vector.extract_strided_slice %210 {offsets = [0, 0], sizes = [2, 32], strides = [1, 1]} : vector<2x128xf32> to vector<2x32xf32>
    %212 = arith.negf %211 : vector<2x32xf32>
    %213 = math.exp %212 : vector<2x32xf32>
    %cst_51 = arith.constant 1.000000e+00 : f32
    %214 = vector.broadcast %cst_51 : f32 to vector<2x32xf32>
    %215 = arith.addf %214, %213 : vector<2x32xf32>
    %216 = arith.divf %214, %215 : vector<2x32xf32>
    %217 = vector.extract_strided_slice %210 {offsets = [0, 32], sizes = [2, 32], strides = [1, 1]} : vector<2x128xf32> to vector<2x32xf32>
    %218 = arith.negf %217 : vector<2x32xf32>
    %219 = math.exp %218 : vector<2x32xf32>
    %cst_52 = arith.constant 1.000000e+00 : f32
    %220 = vector.broadcast %cst_52 : f32 to vector<2x32xf32>
    %221 = arith.addf %220, %219 : vector<2x32xf32>
    %222 = arith.divf %220, %221 : vector<2x32xf32>
    %223 = vector.extract_strided_slice %210 {offsets = [0, 64], sizes = [2, 32], strides = [1, 1]} : vector<2x128xf32> to vector<2x32xf32>
    %224 = math.tanh %223 : vector<2x32xf32>
    %225 = vector.extract_strided_slice %210 {offsets = [0, 96], sizes = [2, 32], strides = [1, 1]} : vector<2x128xf32> to vector<2x32xf32>
    %226 = arith.negf %225 : vector<2x32xf32>
    %227 = math.exp %226 : vector<2x32xf32>
    %cst_53 = arith.constant 1.000000e+00 : f32
    %228 = vector.broadcast %cst_53 : f32 to vector<2x32xf32>
    %229 = arith.addf %228, %227 : vector<2x32xf32>
    %230 = arith.divf %228, %229 : vector<2x32xf32>
    %231 = arith.mulf %222, %201 : vector<2x32xf32>
    %232 = arith.mulf %216, %224 : vector<2x32xf32>
    %233 = arith.addf %231, %232 : vector<2x32xf32>
    %234 = math.tanh %233 : vector<2x32xf32>
    %235 = arith.mulf %230, %234 : vector<2x32xf32>
    %c0_54 = arith.constant 0 : index
    %c6 = arith.constant 6 : index
    %c0_55 = arith.constant 0 : index
    %236 = vector.load %arg5[%c0_54, %c6, %c0_55] : memref<2x8x32xf32, #tpu.memory_space<vmem>>, vector<2x1x32xf32>
    %237 = vector.shape_cast %236 : vector<2x1x32xf32> to vector<2x32xf32>
    %238 = vector.shape_cast %235 : vector<2x32xf32> to vector<2x1x32xf32>
    tpu.vector_store %arg5[%c0_54, %c6, %c0_55], %238 {strides = array<i32>} : memref<2x8x32xf32, #tpu.memory_space<vmem>>, vector<2x1x32xf32>,
    %239 = vector.extract_strided_slice %12 {offsets = [0, 7, 0], sizes = [2, 1, 128], strides = [1, 1, 1]} : vector<2x8x128xf32> to vector<2x1x128xf32>
    %240 = vector.shape_cast %239 : vector<2x1x128xf32> to vector<2x128xf32>
    %cst_56 = arith.constant dense<0.000000e+00> : vector<2x128xf32>
    %241 = tpu.matmul %235, %4, %cst_56 {dimension_numbers = #tpu.dot_dimension_numbers<[1], [0], [0], [1], [0, 0, 1, 1], [], []>, precision = #tpu.contract_precision<fp32>} : vector<2x32xf32>, vector<32x128xf32>, vector<2x128xf32> -> vector<2x128xf32>
    %242 = arith.addf %240, %241 : vector<2x128xf32>
    %243 = vector.extract_strided_slice %242 {offsets = [0, 0], sizes = [2, 32], strides = [1, 1]} : vector<2x128xf32> to vector<2x32xf32>
    %244 = arith.negf %243 : vector<2x32xf32>
    %245 = math.exp %244 : vector<2x32xf32>
    %cst_57 = arith.constant 1.000000e+00 : f32
    %246 = vector.broadcast %cst_57 : f32 to vector<2x32xf32>
    %247 = arith.addf %246, %245 : vector<2x32xf32>
    %248 = arith.divf %246, %247 : vector<2x32xf32>
    %249 = vector.extract_strided_slice %242 {offsets = [0, 32], sizes = [2, 32], strides = [1, 1]} : vector<2x128xf32> to vector<2x32xf32>
    %250 = arith.negf %249 : vector<2x32xf32>
    %251 = math.exp %250 : vector<2x32xf32>
    %cst_58 = arith.constant 1.000000e+00 : f32
    %252 = vector.broadcast %cst_58 : f32 to vector<2x32xf32>
    %253 = arith.addf %252, %251 : vector<2x32xf32>
    %254 = arith.divf %252, %253 : vector<2x32xf32>
    %255 = vector.extract_strided_slice %242 {offsets = [0, 64], sizes = [2, 32], strides = [1, 1]} : vector<2x128xf32> to vector<2x32xf32>
    %256 = math.tanh %255 : vector<2x32xf32>
    %257 = vector.extract_strided_slice %242 {offsets = [0, 96], sizes = [2, 32], strides = [1, 1]} : vector<2x128xf32> to vector<2x32xf32>
    %258 = arith.negf %257 : vector<2x32xf32>
    %259 = math.exp %258 : vector<2x32xf32>
    %cst_59 = arith.constant 1.000000e+00 : f32
    %260 = vector.broadcast %cst_59 : f32 to vector<2x32xf32>
    %261 = arith.addf %260, %259 : vector<2x32xf32>
    %262 = arith.divf %260, %261 : vector<2x32xf32>
    %263 = arith.mulf %254, %233 : vector<2x32xf32>
    %264 = arith.mulf %248, %256 : vector<2x32xf32>
    %265 = arith.addf %263, %264 : vector<2x32xf32>
    %266 = math.tanh %265 : vector<2x32xf32>
    %267 = arith.mulf %262, %266 : vector<2x32xf32>
    %c0_60 = arith.constant 0 : index
    %c7 = arith.constant 7 : index
    %c0_61 = arith.constant 0 : index
    %268 = vector.load %arg5[%c0_60, %c7, %c0_61] : memref<2x8x32xf32, #tpu.memory_space<vmem>>, vector<2x1x32xf32>
    %269 = vector.shape_cast %268 : vector<2x1x32xf32> to vector<2x32xf32>
    %270 = vector.shape_cast %267 : vector<2x32xf32> to vector<2x1x32xf32>
    tpu.vector_store %arg5[%c0_60, %c7, %c0_61], %270 {strides = array<i32>} : memref<2x8x32xf32, #tpu.memory_space<vmem>>, vector<2x1x32xf32>,
    %c0_62 = arith.constant 0 : index
    %c0_63 = arith.constant 0 : index
    %271 = vector.load %arg6[%c0_62, %c0_63] : memref<2x32xf32, #tpu.memory_space<vmem>>, vector<2x32xf32>
    tpu.vector_store %arg6[%c0_62, %c0_63], %267 {strides = array<i32>} : memref<2x32xf32, #tpu.memory_space<vmem>>, vector<2x32xf32>,
    %c0_64 = arith.constant 0 : index
    %c0_65 = arith.constant 0 : index
    %272 = vector.load %arg7[%c0_64, %c0_65] : memref<2x32xf32, #tpu.memory_space<vmem>>, vector<2x32xf32>
    tpu.vector_store %arg7[%c0_64, %c0_65], %265 {strides = array<i32>} : memref<2x32xf32, #tpu.memory_space<vmem>>, vector<2x32xf32>,
    return
  }
  func.func @transform_0(%arg0: i32) -> (i32, i32, i32) {
    %c0_i32 = arith.constant 0 : i32
    %c0_i32_0 = arith.constant 0 : i32
    %c0_i32_1 = arith.constant 0 : i32
    return %c0_i32, %arg0, %c0_i32_0 : i32, i32, i32
  }
  func.func @transform_1(%arg0: i32) -> (i32, i32) {
    %c0_i32 = arith.constant 0 : i32
    %c0_i32_0 = arith.constant 0 : i32
    %c0_i32_1 = arith.constant 0 : i32
    return %c0_i32, %c0_i32_0 : i32, i32
  }
  func.func @transform_2(%arg0: i32) -> (i32, i32) {
    %c0_i32 = arith.constant 0 : i32
    %c0_i32_0 = arith.constant 0 : i32
    %c0_i32_1 = arith.constant 0 : i32
    return %c0_i32, %c0_i32_0 : i32, i32
  }
  func.func @transform_3(%arg0: i32) -> (i32, i32) {
    %c0_i32 = arith.constant 0 : i32
    %c0_i32_0 = arith.constant 0 : i32
    %c0_i32_1 = arith.constant 0 : i32
    return %c0_i32, %c0_i32_0 : i32, i32
  }
  func.func @transform_4(%arg0: i32) -> (i32, i32, i32) {
    %c0_i32 = arith.constant 0 : i32
    %c0_i32_0 = arith.constant 0 : i32
    %c0_i32_1 = arith.constant 0 : i32
    return %c0_i32, %arg0, %c0_i32_0 : i32, i32, i32
  }
  func.func @transform_5(%arg0: i32) -> (i32, i32) {
    %c0_i32 = arith.constant 0 : i32
    %c0_i32_0 = arith.constant 0 : i32
    %c0_i32_1 = arith.constant 0 : i32
    return %c0_i32, %c0_i32_0 : i32, i32
  }
  func.func @transform_6(%arg0: i32) -> (i32, i32) {
    %c0_i32 = arith.constant 0 : i32
    %c0_i32_0 = arith.constant 0 : i32
    %c0_i32_1 = arith.constant 0 : i32
    return %c0_i32, %c0_i32_0 : i32, i32
  }
}

</mosaic_0001>

<bundles_post_ra>
// kernel: tpu_custom_call.1
= control target key start
LH: loop header
LB: loop body
LE: loop exit
PB: predicated region body
PF: predicated region fallthrough
CT: control target
= control target key end

     0   :  { %12 = vsyncpa [#allocation3], 0  ;;  %s8209_s0 = inlined_call_operand.hbm [shape: f32[2,16,16], index: 0, kind: input, shape index: {}]   ;;  %s8210_s1 = inlined_call_operand.hbm [shape: f32[16,128], index: 1, kind: input, shape index: {}]   ;;  %s8211_s2 = inlined_call_operand.hbm [shape: f32[32,128], index: 2, kind: input, shape index: {}]   ;;  %s8212_s3 = inlined_call_operand.vmem [shape: f32[1,128], index: 3, kind: input, shape index: {}]   ;;  %s8213_s4 = inlined_call_operand.hbm [shape: f32[2,16,32], index: 4, kind: output, shape index: {0}]   ;;  %s8214_s5 = inlined_call_operand.hbm [shape: f32[2,32], index: 5, kind: output, shape index: {1}]   ;;  %s8215_s6 = inlined_call_operand.hbm [shape: f32[2,32], index: 6, kind: output, shape index: {2}]  }
   0x1   :  { %14 = vsyncpa [#allocation3 + $0x1], 0 }
   0x2   :  { %15 = vsyncpa [#allocation6], 0 }
   0x3   :  { %16 = vsyncpa [#allocation4], 0 }
   0x4   :  { %18 = vsyncpa [#allocation4 + $0x1], 0 }
   0x5   :  { %19 = vsyncpa [#allocation10], 0  ;;  %s7265_s21 = smov 0   ;;  %s7267_s22 = smov 0  }
   0x6   :  { %s7269_s23 = smov 0   ;;  %s7271_s24 = smov 0  }
   0x7 LB: > { %s7286_s25 = sadd.s32 4294967295, %s7209_s24   ;;  %s5502_s26 = sadd.s32 4294967294, %s7209_s24   ;;  %s7209_s24 = sphi %s7271_s24, %s8255_s24   ;;  %s7205_s23 = sphi %s7269_s23, %s8254_s23   ;;  %s7201_s22 = sphi %s7267_s22, %s8253_s22   ;;  %s7197_s21 = sphi %s7265_s21, %s8252_s21  }
   0x8   : > { %s7290_s27 = sadd.s32 1, %s7209_s24   ;;  %s32_s28 = sadd.s32 1, %s7205_s23 }
   0x9   : > { %s29_s29 = ssub.s32 %s7209_s24, %s7290_s27  ;;  %p39_p0 = scmp.ne.s32.totalorder %s7205_s23, %s7201_s22 }
   0xa   : > { %p30_p1 = scmp.eq.s32.totalorder %s29_s29, 0  ;;  %p40_p2 = scmp.eq.s32.totalorder %s7209_s24, 0 }
   0xb   : > { %p45_p3 = scmp.ne.s32.totalorder %s7201_s22, %s7197_s21  ;;  %p8217_p4 = scmp.eq.s32.totalorder %s7286_s25, 0 }
   0xc   : > { %s7302_s30 = scalar_select %p30_p1, %s7205_s23, %s32_s28  }
   0xd   : > { %p7304_p5 = por %p40_p2, %p39_p0  ;;  %p7310_p6 = por %p8217_p4, %p45_p3 }
   0xe   : > { %8223 = sst [smem:[#allocation16_spill]] %s7302_s30  ;;  %p8216_p7 = scmp.eq.s32.totalorder %s7286_s25, 1 }
   0xf   : > { %s8224_s7 = scalar_select %p7304_p5, 1, 0 }
  0x10   : > { %s8225_s8 = scalar_select %p7310_p6, 1, 0 }
  0x11   : > { %p138_p8 = scmp.eq.s32.totalorder %s5502_s26, 1  ;;  %p5503_p9 = scmp.ge.s32.totalorder %s7209_s24, 1 }
  0x12   : > { %p187_p10 = scmp.lt.s32.totalorder %s7209_s24, 3  ;;  %p7319_p11 = por %p8216_p7, %p39_p0 }
  0x13   : > { %p7323_p12 = por %p138_p8, %p45_p3  ;;  %s7211_s12 = smov [#allocation5]  }
  0x14   : > { %s8226_s9 = scalar_select %p7319_p11, 1, 0 }
  0x15   : > { %s8227_s10 = scalar_select %p7323_p12, 1, 0 }
  0x16   : > { %p7327_p13 = pnand %p5503_p9, %p187_p10  ;;  %s199_s13 = sshll.u32 %s7211_s12, 4  ;;  %s200_s13 = int_to_ptr.vmem [resolvable:$true] %s199_s13 }
  0x17   : > { %s7212_s15 = smov [#allocation7]   ;;  %s6997_s19 = scalar_lea.hbm %s8210_s1, 256 }
  0x18   : > { %s8228_s11 = scalar_select %p7327_p13, 1, 0 }
  0x19   : > { %p6795_p2 = pneg %p7327_p13  ;;  %s212_s16 = sshll.u32 %s7212_s15, 4  ;;  %s213_s16 = int_to_ptr.vmem [resolvable:$true] %s212_s16 }
  0x1a   : > { %p6998_p9 = scmp.ne.s32.totalorder %s8210_s1, %s6997_s19  ;;  %p7004_p3 = scmp.lt.u32.totalorder %s6997_s19, %s8210_s1 }
  0x1b   : > { %p7336_p0 = pnand %p6795_p2, %p8217_p4 }
  0x1d   : > { %p6999_p10 = pneg %p7336_p0 }
  0x1f   : > { %p7000_p2 = pnand %p6999_p10, %p6998_p9 }
  0x21   : > { %p7001_p7 = pneg %p7000_p2 }
  0x23   : > { %p7006_p1 = pnand %p7004_p3, %p7001_p7 }
  0x25   : > { %7009 = shalt.err (!%p7006_p1)
}
  0x26   : > { %s7010_s12 = scalar_lea.vmem %s200_s13, 256  ;;  %p7018_p11 = scmp.lt.s32.totalorder %s200_s13, %s200_s13 }
  0x27   : > { %p7011_p4 = scmp.ne.s32.totalorder %s200_s13, %s7010_s12  ;;  %p7019_p6 = scmp.lt.s32.totalorder %s7010_s12, %s7010_s12 }
  0x29   : > { %p7013_p8 = pnand %p7011_p4, %p6999_p10  ;;  %p7020_p13 = por %p7019_p6, %p7018_p11 }
  0x2b   : > { %p7014_p12 = pneg %p7013_p8 }
  0x2d   : > { %p7021_p5 = pnand %p7020_p13, %p7014_p12 }
  0x2f   : > { %7024 = shalt.err (!%p7021_p5)
}
  0x30   : > { %s8222_s15 = smov 128   ;;  %s7214_s17 = smov 8  }
  0x31   : > { %6798 = dma.hbm_to_vmem [thread:$0]  (!%p7336_p0), %s8210_s1, 256, %s200_s13, [#allocation6], %s8222_s15, %s8222_s15, %s7214_s17  }
  0x32   : > { %p8230_p4 = scmp.ne.s32.totalorder %s8224_s7, 0  ;;  %p8231_p7 = scmp.lt.s32.totalorder %s7209_s24, 2 }
  0x33   : > { %s7025_s29 = scalar_lea.hbm %s8211_s2, 512 }
  0x34   : > { %p7371_p1 = pnand %p8231_p7, %p8230_p4  ;;  %p7026_p5 = scmp.ne.s32.totalorder %s8211_s2, %s7025_s29 }
  0x35   : > { %p7032_p12 = scmp.lt.u32.totalorder %s7025_s29, %s8211_s2 }
  0x36   : > { %s8232_s20 = scalar_select %p7371_p1, 1, 0 }
  0x37   : > { %p7028_p6 = pnand %p7026_p5, %p6999_p10 }
  0x39   : > { %p7029_p11 = pneg %p7028_p6 }
  0x3b   : > { %p7034_p13 = pnand %p7032_p12, %p7029_p11 }
  0x3d   : > { %7037 = shalt.err (!%p7034_p13)
}
  0x3e   : > { %s7038_s18 = scalar_lea.vmem %s213_s16, 512  ;;  %p7046_p2 = scmp.lt.s32.totalorder %s213_s16, %s213_s16 }
  0x3f   : > { %p7039_p3 = scmp.ne.s32.totalorder %s213_s16, %s7038_s18  ;;  %p7047_p4 = scmp.lt.s32.totalorder %s7038_s18, %s7038_s18 }
  0x41   : > { %p7041_p8 = pnand %p7039_p3, %p6999_p10  ;;  %p7048_p7 = por %p7047_p4, %p7046_p2 }
  0x43   : > { %p7042_p9 = pneg %p7041_p8 }
  0x45   : > { %p7049_p1 = pnand %p7048_p7, %p7042_p9 }
  0x47   : > { %7052 = shalt.err (!%p7049_p1)
}
  0x48   : > { %6801 = dma.hbm_to_vmem [thread:$0]  (!%p7336_p0), %s8211_s2, 512, %s213_s16, [#allocation6], %s8222_s15, %s8222_s15, %s7214_s17  }
  0x49   : > { %s229_s26 = sand.u32 1, %s7205_s23   ;;  %s5508_s29 = sshll.u32 %s7209_s24, 7 }
  0x4a   : > { %s5507_s28 = sshll.u32 %s229_s26, 4  ;;  %s7403_s7 = scalar_lea.hbm %s8209_s0, %s5508_s29 }
  0x4b   : > { %s233_s14 = scalar_lea.vmem [#allocation2], %s5507_s28  ;;  %s7407_s30 = scalar_lea.sflag [#allocation3], %s229_s26 }
  0x4c   : > { %s239_s18 = sshll.u32 %s233_s14, 4  ;;  %s7053_s19 = scalar_lea.hbm %s7403_s7, 256  ;;  %s7405_s18 = int_to_ptr.vmem [resolvable:$true] %s239_s18 }
  0x4d   : > { %p7054_p0 = scmp.ne.s32.totalorder %s7403_s7, %s7053_s19  ;;  %p8233_p10 = scmp.ne.s32.totalorder %s8232_s20, 0 }
  0x4e   : > { %s7058_s12 = scalar_lea.hbm %s8209_s0, 512  ;;  %p7059_p11 = scmp.lt.u32.totalorder %s7403_s7, %s8209_s0 }
  0x4f   : > { %p7055_p1 = pneg %p8233_p10  ;;  %p7060_p12 = scmp.lt.u32.totalorder %s7058_s12, %s7053_s19 }
  0x50   : > { %p7062_p3 = scmp.lt.u32.totalorder %s7053_s19, %s7403_s7 }
  0x51   : > { %p7056_p5 = pnand %p7055_p1, %p7054_p0  ;;  %p7061_p13 = por %p7060_p12, %p7059_p11 }
  0x53   : > { %p7057_p6 = pneg %p7056_p5  ;;  %p7063_p8 = por %p7062_p3, %p7061_p13 }
  0x55   : > { %p7064_p9 = pnand %p7063_p8, %p7057_p6 }
  0x57   : > { %7067 = shalt.err (!%p7064_p9)
}
  0x58   : > { %s7068_s26 = scalar_lea.vmem %s7405_s18, 256  ;;  %s7215_s28 = smov [#allocation2]  }
  0x59   : > { %p7069_p2 = scmp.ne.s32.totalorder %s7405_s18, %s7068_s26  ;;  %s7073_s14 = sshll.u32 %s7215_s28, 4  ;;  %s7074_s14 = int_to_ptr.vmem [resolvable:$false] %s7073_s14 }
  0x5a   : > { %s7075_s15 = scalar_lea.vmem %s7074_s14, 512  ;;  %p7076_p0 = scmp.lt.s32.totalorder %s7405_s18, %s7074_s14 }
  0x5b   : > { %p7071_p4 = pnand %p7069_p2, %p7055_p1  ;;  %p7077_p5 = scmp.lt.s32.totalorder %s7075_s15, %s7068_s26 }
  0x5d   : > { %p7072_p7 = pneg %p7071_p4  ;;  %p7078_p11 = por %p7077_p5, %p7076_p0 }
  0x5f   : > { %p7079_p12 = pnand %p7078_p11, %p7072_p7 }
  0x61   : > { %7082 = shalt.err (!%p7079_p12)
}
  0x62   : > { %s7216_s19 = smov 256   ;;  %s8234_s16 = smov 128  }
  0x63   : > { %6805 = dma.hbm_to_vmem [thread:$0]  (!%p8233_p10), %s7403_s7, 256, %s7405_s18, %s7407_s30, %s7216_s19, %s8234_s16, %s7214_s17  }
  0x64   : > { %p8235_p1 = scmp.ne.s32.totalorder %s8228_s11, 0 }
  0x65   : > { %s7440_s29 = sand.u32 (!%p8235_p1), 1, %s7201_s22   ;;  %p8236_p6 = scmp.ne.s32.totalorder (!%p8235_p1), %s8225_s8, 0 }
  0x66   : > { %251 = sbr.rel (%p8235_p1) target bundleno = 6256 (0x1870), region = 36  ;;  %s5510_s12 = sshll.u32 (!%p8235_p1), %s7440_s29, 4 }
  0x67   : > { %s254_s13 = scalar_lea.sflag (!%p8235_p1), [#allocation3], %s7440_s29  ;;  %s257_s26 = scalar_lea.vmem (!%p8235_p1), [#allocation2], %s5510_s12 }
  0x6d   : > { %7180 = dma.done.wait (%p8236_p6), %s254_s13, 256  }
  0x6e   : > { %7182 = vsyncadd (%p8236_p6), %s254_s13, 4294967040  ;;  %p8237_p13 = scmp.eq.s32.totalorder %s7286_s25, 0 }
  0x70   : > { %7184 = dma.done.wait (%p8237_p13), [#allocation6], 768   ;;  %p8238_p10 = pmov %p8237_p13 }
  0x71   : > { %s7452_s11 = scalar_lea.vmem [#allocation8], %s5510_s12  ;;  %p8239_p3 = scmp.ne.s32.totalorder %s7286_s25, 0 }
  0x72   : > { %7186 = vsyncadd (%p8238_p10), [#allocation6], 4294966528  ;;  %vm298_vm0 = vcmask (!%p8239_p3), 254976   ;;  %v7217_v0 = vmov (!%p8239_p3), 0.0  }
  0x73   : > { %297 = sbr.rel (%p8239_p3) target bundleno = 122 (0x7a), region = 52  ;;  %299 = vst.msk [vmem:[#allocation9] sm:$0x3] (!%p8239_p3), %vm298_vm0, %v7217_v0  ;;  %300 = vst.msk [vmem:[#allocation11] sm:$0x3] (!%p8239_p3), %vm298_vm0, %v7217_v0 }
  0x7a PF: > { %v301_v1 = vld [vmem:[#allocation5] sm:$0xff]  ;;  %v302_v2 = vld [vmem:[#allocation5 + $0x8] sm:$0xff]  ;;  %vm310_vm1 = vcmask 130048   ;;  %v303_v8 = vld [vmem:[#allocation7] sm:$0xff]  ;;  %vm829_vm2 = vcmask 261120   ;;  %v7218_v29 = vmov 0.0|0.0  }
  0x7b   : > { %v308_v3 = vld [vmem:[%s257_s26] sm:$0xff]  ;;  %v318_v4 = vand.u32 4294901760, %v301_v1  ;;  %v321_v5 = vand.u32 4294901760, %v302_v2  ;;  %v309_v6 = vld [vmem:[%s257_s26 + $0x8] sm:$0xff]  ;;  %v834_v12 = vand.u32 4294901760, %v303_v8  ;;  %vm7219_vm3 = vmmov 0  }
  0x7c   : > { %v312_v7 = vsel %vm310_vm1, %v308_v3, 0  ;;  %v304_v9 = vld [vmem:[#allocation7 + $0x8] sm:$0xff]  ;;  %v315_v10 = vsel %vm310_vm1, %v309_v6, 0  ;;  %v305_v14 = vld [vmem:[#allocation7 + $0x10] sm:$0xff]  ;;  %v306_v19 = vld [vmem:[#allocation7 + $0x18] sm:$0xff]  ;;  %v7220_v61 = vmov 0.0  }
  0x7d   : > { %v7456_v11 = vand.u32 4294901760, %v312_v7  ;;  %v837_v13 = vand.u32 4294901760, %v304_v9  ;;  %v7458_v15 = vpack.c.bf16 %v321_v5, %v318_v4  ;;  %v7460_v16 = vand.u32 4294901760, %v315_v10  ;;  %v827_v22 = vld [vmem:[#allocation9] sm:$0x3]  ;;  %s7221_s8 = smov 32  }
  0x7e   : > { %v7462_v17 = vsub.f32 %v301_v1, %v318_v4  ;;  %v7464_v18 = vsub.f32 %v302_v2, %v321_v5  ;;  %v840_v26 = vand.u32 4294901760, %v305_v14  ;;  %v843_v28 = vand.u32 4294901760, %v306_v19  ;;  %v828_v54 = vld [vmem:[#allocation11] sm:$0x3]  ;;  %s7222_s7 = smov 64   ;;  %s7223_s18 = smov 96  }
  0x7f   : > { %v7467_v20 = vsub.f32 %v312_v7, %v7456_v11  ;;  %v7469_v21 = vpack.c.bf16 %v837_v13, %v834_v12  ;;  %5815 = vmatprep.mubr.f32.mxu0 %v7456_v11  ;;  %6375 = vmatprep.subr.bf16.mxu1 %v7458_v15  ;;  %v7474_v23 = vsub.f32 %v315_v10, %v7460_v16  ;;  %v831_v33 = vsel %vm829_vm2, %v827_v22, 0  ;;  %s7224_s30 = smov [#allocation9]   ;;  %s5533_s14 = sshll.u32 %s7286_s25, 7 }
  0x80   : > { %v407_v24 = vand.u32 4294901760, %v7462_v17  ;;  %v414_v25 = vand.u32 4294901760, %v7464_v18  ;;  %6377 = vmatpush3.bf16.msra.mxu1 %v7458_v15  ;;  %v7492_v35 = vand.u32 4294901760, %v831_v33  ;;  %v7494_v36 = vsub.f32 %v303_v8, %v834_v12  ;;  %s5381_s28 = sshll.u32 %s7224_s30, 4  ;;  %s5367_s15 = sshll.u32 %s7452_s11, 4  ;;  %s5382_s28 = int_to_ptr.vmem [resolvable:$true] %s5381_s28  ;;  %s8117_s15 = int_to_ptr.vmem [resolvable:$true] %s5367_s15 }
  0x81   : > { %v386_v27 = vand.u32 4294901760, %v7467_v20  ;;  %6398 = vmatprep.subr.bf16.mxu1 %v7218_v29  ;;  %v396_v30 = vand.u32 4294901760, %v7474_v23  ;;  %v7496_v37 = vsub.f32 %v304_v9, %v837_v13  ;;  %v7501_v41 = vsub.f32 %v305_v14, %v840_v26  ;;  %s8115_s12 = scalar_lea.hbm %s8213_s4, %s5533_s14  ;;  %s7225_s13 = smov [#allocation11]  }
  0x82   : > { %v408_v31 = vsub.f32 %v7462_v17, %v407_v24  ;;  %v415_v32 = vsub.f32 %v7464_v18, %v414_v25  ;;  %v7504_v43 = vsub.f32 %v831_v33, %v7492_v35  ;;  %v915_v44 = vand.u32 4294901760, %v7494_v36  ;;  %s8120_s26 = sshll.u32 %s7225_s13, 4  ;;  %p8240_p9 = scmp.eq.s32.totalorder %s7286_s25, 1  ;;  %s5393_s26 = int_to_ptr.vmem [resolvable:$true] %s8120_s26 }
  0x83   : > { %v387_v34 = vsub.f32 %v7467_v20, %v386_v27  ;;  %v397_v38 = vsub.f32 %v7474_v23, %v396_v30  ;;  %v922_v45 = vand.u32 4294901760, %v7496_v37  ;;  %v929_v48 = vand.u32 4294901760, %v7501_v41  ;;  %p7090_p7 = scmp.lt.s32.totalorder %s5382_s28, %s5382_s28 }
  0x84   : > { %v409_v39 = vand.u32 4294901760, %v408_v31  ;;  %v416_v40 = vand.u32 4294901760, %v415_v32  ;;  %v7509_v49 = vsub.f32 %v306_v19, %v843_v28  ;;  %v904_v50 = vand.u32 4294901760, %v7504_v43 }
  0x85   : > { %v388_v42 = vand.u32 4294901760, %v387_v34  ;;  %v398_v46 = vand.u32 4294901760, %v397_v38  ;;  %v6382_v51 = vpack.c.bf16 %v7464_v18, %v7462_v17  ;;  %v916_v52 = vsub.f32 %v7494_v36, %v915_v44 }
  0x86   : > { %v6378_v47 = vpack.c.bf16 %v416_v40, %v409_v39  ;;  %v923_v53 = vsub.f32 %v7496_v37, %v922_v45  ;;  %v7520_v55 = vpack.c.bf16 %v843_v28, %v840_v26  ;;  %v936_v56 = vand.u32 4294901760, %v7509_v49 }
  0x87   : > { %5808 = vmatprep.mubr.f32.mxu1 %v388_v42  ;;  %v905_v57 = vsub.f32 %v7504_v43, %v904_v50  ;;  %v917_v58 = vand.u32 4294901760, %v916_v52  ;;  %v930_v60 = vsub.f32 %v7501_v41, %v929_v48  ;;  %v1339_v63 = vrot.slane %v828_v54, 1 }
  0x88   : > { %5809 = vmatmul.mubr.f32.vlgmr.msra.gmra.mrb[0].mxu1 %v398_v46  ;;  %6379 = vmatprep.subr.bf16.mxu0 %v6378_v47  ;;  %v924_v59 = vand.u32 4294901760, %v923_v53  ;;  %v937_v62 = vsub.f32 %v7509_v49, %v936_v56  ;;  %v6390_v5 = vpack.c.bf16 %v414_v25, %v407_v24  ;;  %v7559_v6 = vpack.c.bf16 %v7496_v37, %v7494_v36 }
  0x89   : > { %6400 = vmatpush3.bf16.msra.mxu1 %v7469_v21  ;;  %6381 = vmatpush3.bf16.msra.mxu0 %v6378_v47  ;;  %v906_v0 = vand.u32 4294901760, %v905_v57  ;;  %v931_v2 = vand.u32 4294901760, %v930_v60  ;;  %v7569_v7 = vpack.c.bf16 %v7509_v49, %v7501_v41  ;;  %v7591_v8 = vpack.c.bf16 %v922_v45, %v915_v44 }
  0x8a   : > { %6401 = vmatprep.subr.bf16.mxu1 %v7218_v29  ;;  %5854 = vmatprep.mubr.msk.f32.mxu1 %vm7219_vm3, %v7220_v61  ;;  %v7539_v1 = vpack.c.bf16 %v924_v59, %v917_v58  ;;  %v938_v3 = vand.u32 4294901760, %v937_v62  ;;  %v7604_v9 = vpack.c.bf16 %v936_v56, %v929_v48  ;;  %vm1392_vm4 = vcmask 1041409  }
  0x8b   : > { %6383 = vmatprep.subr.bf16.mxu0 %v6382_v51  ;;  %1342 = vrot.lane.b32.xlu1 %v1339_v63, %s7221_s8  ;;  %vm1388_vm5 = vcmask 253952   ;;  %vm1951_vm6 = vcmask 254977   ;;  %vm2514_vm7 = vcmask 256002   ;;  %vm3078_vm8 = vcmask 257027  }
  0x8c   : > { %5816 = vmatmul.mubr.f32.vlgmr.msra.gmra.mrb[0].mxu0 %v7460_v16  ;;  %v7546_v4 = vpack.c.bf16 %v938_v3, %v931_v2  ;;  %vm3642_vm9 = vcmask 258052   ;;  %vm4206_vm10 = vcmask 259077   ;;  %vm4770_vm11 = vcmask 260102  }
  0x8d   : > { %6403 = vmatpush3.bf16.msra.mxu1 %v7520_v55  ;;  %6385 = vmatpush3.bf16.msra.mxu0 %v6382_v51  ;;  %vm5334_vm12 = vcmask 261127  }
  0x8e   : > { %6404 = vmatprep.subr.bf16.mxu1 %v7218_v29  ;;  %5822 = vmatprep.mubr.f32.mxu0 %v7467_v20 }
  0x8f   : > { %6387 = vmatprep.subr.bf16.mxu0 %v7458_v15  ;;  %1340 = vrot.lane.b32.xlu1 %v828_v54, %s7221_s8 }
  0x90   : > { %5855 = vmatmul.mubr.f32.vlgmr.msra.gmra.mrb[2].mxu1 %v906_v0 }
  0x91   : > { %6406 = vmatpush3.bf16.msra.mxu1 %v7539_v1  ;;  %5865 = vmatprep.mubr.msk.f32.mxu1 %vm7219_vm3, %v7220_v61 }
  0x92   : > { %6407 = vmatprep.subr.bf16.mxu1 %v7218_v29 }
  0x94   : > { %5823 = vmatmul.mubr.f32.vlgmr.msra.gmra.mrb[0].mxu0 %v7474_v23 }
  0x95   : > { %6409 = vmatpush3.bf16.msra.mxu1 %v7546_v4  ;;  %6389 = vmatpush3.bf16.msra.mxu0 %v7458_v15 }
  0x96   : > { %6410 = vmatprep.subr.bf16.mxu1 %v7218_v29  ;;  %5829 = vmatprep.mubr.f32.mxu0 %v386_v27 }
  0x97   : > { %6391 = vmatprep.subr.bf16.mxu0 %v6390_v5 }
  0x98   : > { %5866 = vmatmul.mubr.f32.vlgmr.msra.gmra.mrb[2].mxu1 %v7492_v35 }
  0x99   : > { %6412 = vmatpush3.bf16.msra.mxu1 %v7559_v6  ;;  %5876 = vmatprep.mubr.msk.f32.mxu1 %vm7219_vm3, %v7220_v61 }
  0x9a   : > { %6413 = vmatprep.subr.bf16.mxu1 %v7218_v29 }
  0x9c   : > { %5830 = vmatmul.mubr.f32.vlgmr.msra.gmra.mrb[0].mxu0 %v396_v30 }
  0x9d   : > { %6415 = vmatpush3.bf16.msra.mxu1 %v7569_v7  ;;  %6393 = vmatpush3.bf16.msra.mxu0 %v6390_v5 }
  0x9e   : > { %6416 = vmatprep.subr.bf16.mxu1 %v7218_v29  ;;  %5836 = vmatprep.mubr.f32.mxu0 %v7456_v11 }
  0x9f   : > { %6395 = vmatprep.subr.bf16.mxu0 %v7458_v15 }
  0xa0   : > { %5877 = vmatmul.mubr.f32.vlgmr.msra.gmra.mrb[2].mxu1 %v7504_v43 }
  0xa1   : > { %6418 = vmatpush3.bf16.msra.mxu1 %v7469_v21  ;;  %5887 = vmatprep.mubr.msk.f32.mxu1 %vm7219_vm3, %v7220_v61 }
  0xa2   : > { %6419 = vmatprep.subr.bf16.mxu1 %v7218_v29 }
  0xa4   : > { %5837 = vmatmul.mubr.f32.vlgmr.msra.gmra.mrb[0].mxu0 %v7460_v16 }
  0xa5   : > { %6421 = vmatpush3.bf16.msra.mxu1 %v7520_v55  ;;  %6397 = vmatpush3.bf16.msra.mxu0 %v7458_v15 }
  0xa6   : > { %6422 = vmatprep.subr.bf16.mxu1 %v7218_v29  ;;  %5843 = vmatprep.mubr.f32.mxu0 %v7456_v11 }
  0xa7   : > { %6440 = vmatprep.subr.bf16.mxu0 %v7218_v29 }
  0xa8   : > { %5888 = vmatmul.mubr.f32.vlgmr.msra.gmra.mrb[2].mxu1 %v904_v50 }
  0xa9   : > { %6424 = vmatpush3.bf16.msra.mxu1 %v7591_v8  ;;  %5898 = vmatprep.mubr.msk.f32.mxu1 %vm7219_vm3, %v7220_v61 }
  0xaa   : > { %6425 = vmatprep.subr.bf16.mxu1 %v7218_v29 }
  0xac   : > { %5844 = vmatmul.mubr.f32.vlgmr.msra.gmra.mrb[0].mxu0 %v7460_v16  ;;  %v5515_v16 = vld [vmem:[%s8212_s3] ss:$0 sm:$0xff] }
  0xad   : > { %6427 = vmatpush3.bf16.msra.mxu1 %v7604_v9  ;;  %6442 = vmatpush3.bf16.msra.mxu0 %v7539_v1 }
  0xae   : > { %6428 = vmatprep.subr.bf16.mxu1 %v7218_v29  ;;  %6443 = vmatprep.subr.bf16.mxu0 %v7218_v29 }
  0xaf   : > { %5931 = vmatprep.mubr.msk.f32.mxu0 %vm7219_vm3, %v7220_v61 }
  0xb0   : > { %5899 = vmatmul.mubr.f32.vlgmr.msra.gmra.mrb[2].mxu1 %v7492_v35 }
  0xb1   : > { %6430 = vmatpush3.bf16.msra.mxu1 %v7469_v21  ;;  %5909 = vmatprep.mubr.msk.f32.mxu1 %vm7219_vm3, %v7220_v61 }
  0xb2   : > { %6431 = vmatprep.subr.bf16.mxu1 %v7218_v29  ;;  %6445 = vmatpush3.bf16.msra.mxu0 %v7546_v4 }
  0xb3   : > { %6446 = vmatprep.subr.bf16.mxu0 %v7218_v29 }
  0xb5   : > { %6433 = vmatpush3.bf16.msra.mxu1 %v7520_v55 }
  0xb6   : > { %6434 = vmatprep.subr.bf16.mxu1 %v7218_v29 }
  0xb8   : > { %5910 = vmatmul.mubr.f32.vlgmr.msra.gmra.mrb[2].mxu1 %v7492_v35 }
  0xb9   : > { %6436 = vmatpush3.bf16.msra.mxu1 %v7469_v21  ;;  %5920 = vmatprep.mubr.msk.f32.mxu1 %vm7219_vm3, %v7220_v61 }
  0xba   : > { %6437 = vmatprep.subr.bf16.mxu1 %v7218_v29 }
  0xbd   : > { %6439 = vmatpush3.bf16.msra.mxu1 %v7520_v55 }
  0xbe   : > { %6470 = vmatprep.subr.bf16.mxu1 %v7218_v29 }
  0xfd   : > { %v1343_v40 = vpop.permute.xlu1 %1342 }
 0x101   : > { %v1341_v42 = vpop.permute.xlu1 %1340 }
 0x15b   : > { %v5810_v10 = vpop.f32.mrb[0].mxu1 }
 0x15c   : > { %v390_v11 = vpop.f32.mrb[1].mxu1 }
 0x17f   : > { %v5845_v12 = vpop.f32.mrb[0].mxu0 }
 0x180   : > { %v6686_v13 = vadd.f32 %v5845_v12, %v5810_v10  ;;  %v809_v14 = vpop.f32.mrb[1].mxu0 }
 0x181   : > { %v6687_v15 = vadd.f32 %v809_v14, %v390_v11 }
 0x182   : > { %v7635_v18 = vadd.f32 %v6686_v13, %v5515_v16 }
 0x183   : > { %v7638_v23 = vadd.f32 %v6687_v15, %v5515_v16 }
 0x18b   : > { %v1314_v17 = vpop.f32.mrb[2].mxu1 }
 0x18c   : > { %v1319_v19 = vrot.slane %v1314_v17, 1  ;;  %v5911_v20 = vpop.f32.mrb[3].mxu1  ;;  %v1322_v24 = vadd.f32 %v1314_v17, %v7638_v23 }
 0x18e   : > { %v1323_v22 = vadd.f32 %v1319_v19, %v7635_v18  ;;  %v5516_v28 = vmul.f32 -1.442695, %v1322_v24 }
 0x190   : > { %6869 = vtanh.f32 %v1323_v22  ;;  %v5517_v27 = vmul.f32 -1.442695, %v1323_v22 }
 0x191   : > { %6871 = vtanh.f32 %v1322_v24 }
 0x192   : > { %6873 = vpow2.f32 %v5517_v27 }
 0x193   : > { %6875 = vpow2.f32 %v5516_v28 }
 0x19a   : > { %v6870_v25 = vpop.eup %6869 }
 0x19b   : > { %1352 = vrot.lane.b32.xlu0 %v6870_v25, %s7222_s7  ;;  %v6872_v26 = vpop.eup %6871 }
 0x19c   : > { %v6874_v30 = vpop.eup %6873 }
 0x19d   : > { %v1331_v31 = vadd.f32 1.0, %v6874_v30  ;;  %v6876_v32 = vpop.eup %6875 }
 0x19e   : > { %v1330_v33 = vadd.f32 1.0, %v6876_v32 }
 0x19f   : > { %1350 = vrot.lane.b32.xlu0 %v6872_v26, %s7222_s7  ;;  %6877 = vrcp.f32 %v1331_v31 }
 0x1a0   : > { %6879 = vrcp.f32 %v1330_v33 }
 0x1a9   : > { %v6878_v34 = vpop.eup %6877 }
 0x1aa   : > { %v6880_v37 = vpop.eup %6879  ;;  %v1347_v41 = vmul.f32 %v6878_v34, %v1343_v40 }
 0x1ab   : > { %v1346_v45 = vmul.f32 %v6880_v37, %v1341_v42 }
 0x20d   : > { %v1353_v35 = vpop.permute.xlu0 %1352 }
 0x20e   : > { %v1357_v36 = vmul.f32 %v6878_v34, %v1353_v35 }
 0x210   : > { %1362 = vrot.lane.b32.xlu0 %v1357_v36, %s7221_s8 }
 0x211   : > { %v1351_v38 = vpop.permute.xlu0 %1350 }
 0x212   : > { %v1356_v39 = vmul.f32 %v6880_v37, %v1351_v38 }
 0x214   : > { %1360 = vrot.lane.b32.xlu1 %v1356_v39, %s7221_s8 }
 0x282   : > { %v1363_v43 = vpop.permute.xlu0 %1362 }
 0x283   : > { %v7645_v44 = vadd.f32 %v1363_v43, %v1347_v41 }
 0x285   : > { %6881 = vtanh.f32 %v7645_v44  ;;  %v1906_v33 = vrot.slane %v7645_v44, 7 }
 0x286   : > { %v1361_v46 = vpop.permute.xlu1 %1360 }
 0x287   : > { %v7648_v47 = vadd.f32 %v1361_v46, %v1346_v45 }
 0x289   : > { %6883 = vtanh.f32 %v7648_v47  ;;  %v1905_v35 = vrot.slane %v7648_v47, 7 }
 0x28f   : > { %v6882_v48 = vpop.eup %6881 }
 0x290   : > { %1374 = vrot.lane.b32.xlu0 %v6882_v48, %s7222_s7 }
 0x293   : > { %v6884_v49 = vpop.eup %6883 }
 0x294   : > { %1372 = vrot.lane.b32.xlu1 %v6884_v49, %s7222_s7 }
 0x302   : > { %v1375_v50 = vpop.permute.xlu0 %1374 }
 0x303   : > { %v7653_v51 = vmul.f32 %v6878_v34, %v1375_v50 }
 0x305   : > { %v1391_v53 = vrot.slane %v7653_v51, 7 }
 0x306   : > { %v1373_v52 = vpop.permute.xlu1 %1372 }
 0x307   : > { %v7656_v54 = vmul.f32 %v6880_v37, %v1373_v52 }
 0x309   : > { %v1393_v56 = vsel %vm1392_vm4, %v1391_v53, %v7656_v54 }
 0x30a   : > { %1394 = vrot.lane.b32.xlu0 %v1393_v56, %s7221_s8 }
 0x37c   : > { %v1395_v57 = vpop.permute.xlu0 %1394 }
 0x37d   : > { %v1396_v58 = vsel %vm829_vm2, %v1395_v57, 0 }
 0x37e   : > { %v1467_v59 = vand.u32 4294901760, %v1396_v58 }
 0x380   : > { %v1468_v60 = vsub.f32 %v1396_v58, %v1467_v59  ;;  %5932 = vmatmul.mubr.f32.vlgmr.msra.gmra.mrb[2].mxu0 %v1467_v59 }
 0x381   : > { %6448 = vmatpush3.bf16.msra.mxu0 %v7559_v6  ;;  %5942 = vmatprep.mubr.msk.f32.mxu0 %vm7219_vm3, %v7220_v61 }
 0x382   : > { %v1469_v62 = vand.u32 4294901760, %v1468_v60  ;;  %6449 = vmatprep.subr.bf16.mxu0 %v7218_v29 }
 0x384   : > { %v1470_v63 = vsub.f32 %v1468_v60, %v1469_v62 }
 0x385   : > { %6451 = vmatpush3.bf16.msra.mxu0 %v7569_v7 }
 0x386   : > { %v1471_v0 = vand.u32 4294901760, %v1470_v63  ;;  %6452 = vmatprep.subr.bf16.mxu0 %v7218_v29 }
 0x388   : > { %5921 = vmatmul.mubr.f32.vlgmr.msra.gmra.mrb[4].mxu1 %v1471_v0  ;;  %5943 = vmatmul.mubr.f32.vlgmr.msra.gmra.mrb[2].mxu0 %v1468_v60 }
 0x389   : > { %6454 = vmatpush3.bf16.msra.mxu0 %v7469_v21  ;;  %5953 = vmatprep.mubr.msk.f32.mxu0 %vm7219_vm3, %v7220_v61 }
 0x38a   : > { %6455 = vmatprep.subr.bf16.mxu0 %v7218_v29  ;;  %6472 = vmatpush3.bf16.msra.mxu1 %v7469_v21 }
 0x38b   : > { %6473 = vmatprep.subr.bf16.mxu1 %v7218_v29  ;;  %5986 = vmatprep.mubr.msk.f32.mxu1 %vm7219_vm3, %v7220_v61 }
 0x38d   : > { %6457 = vmatpush3.bf16.msra.mxu0 %v7520_v55 }
 0x38e   : > { %6458 = vmatprep.subr.bf16.mxu0 %v7218_v29  ;;  %6475 = vmatpush3.bf16.msra.mxu1 %v7520_v55 }
 0x38f   : > { %6476 = vmatprep.subr.bf16.mxu1 %v7218_v29 }
 0x390   : > { %5954 = vmatmul.mubr.f32.vlgmr.msra.gmra.mrb[2].mxu0 %v1469_v62 }
 0x391   : > { %6460 = vmatpush3.bf16.msra.mxu0 %v7591_v8  ;;  %5964 = vmatprep.mubr.msk.f32.mxu0 %vm7219_vm3, %v7220_v61 }
 0x392   : > { %6461 = vmatprep.subr.bf16.mxu0 %v7218_v29 }
 0x395   : > { %6463 = vmatpush3.bf16.msra.mxu0 %v7604_v9 }
 0x396   : > { %6464 = vmatprep.subr.bf16.mxu0 %v7218_v29 }
 0x398   : > { %5965 = vmatmul.mubr.f32.vlgmr.msra.gmra.mrb[2].mxu0 %v1467_v59 }
 0x399   : > { %6466 = vmatpush3.bf16.msra.mxu0 %v7469_v21  ;;  %5975 = vmatprep.mubr.msk.f32.mxu0 %vm7219_vm3, %v7220_v61 }
 0x39a   : > { %6467 = vmatprep.subr.bf16.mxu0 %v7218_v29 }
 0x39d   : > { %6469 = vmatpush3.bf16.msra.mxu0 %v7520_v55 }
 0x39e   : > { %6506 = vmatprep.subr.bf16.mxu0 %v7218_v29 }
 0x3a0   : > { %5976 = vmatmul.mubr.f32.vlgmr.msra.gmra.mrb[2].mxu0 %v1467_v59 }
 0x3a1   : > { %6508 = vmatpush3.bf16.msra.mxu0 %v7469_v21  ;;  %6052 = vmatprep.mubr.msk.f32.mxu0 %vm7219_vm3, %v7220_v61 }
 0x3a2   : > { %6509 = vmatprep.subr.bf16.mxu0 %v7218_v29 }
 0x3a5   : > { %6511 = vmatpush3.bf16.msra.mxu0 %v7520_v55 }
 0x3a6   : > { %6512 = vmatprep.subr.bf16.mxu0 %v7218_v29 }
 0x45b   : > { %v1473_v2 = vpop.f32.mrb[4].mxu1 }
 0x45c   : > { %v5922_v3 = vpop.f32.mrb[5].mxu1 }
 0x473   : > { %v1879_v5 = vpop.f32.mrb[2].mxu0 }
 0x474   : > { %v6688_v10 = vadd.f32 %v1879_v5, %v1473_v2  ;;  %v5977_v11 = vpop.f32.mrb[3].mxu0 }
 0x476   : > { %v1884_v12 = vrot.slane %v6688_v10, 7  ;;  %v1888_v13 = vadd.f32 %v6688_v10, %v7635_v18 }
 0x478   : > { %v1887_v14 = vadd.f32 %v1884_v12, %v7638_v23  ;;  %6885 = vtanh.f32 %v1888_v13  ;;  %v5519_v17 = vmul.f32 -1.442695, %v1888_v13 }
 0x47a   : > { %6887 = vtanh.f32 %v1887_v14  ;;  %v5518_v19 = vmul.f32 -1.442695, %v1887_v14 }
 0x47b   : > { %6889 = vpow2.f32 %v5519_v17 }
 0x47c   : > { %6891 = vpow2.f32 %v5518_v19 }
 0x482   : > { %v6886_v15 = vpop.eup %6885 }
 0x483   : > { %1915 = vrot.lane.b32.xlu0 %v6886_v15, %s7222_s7 }
 0x484   : > { %v6888_v16 = vpop.eup %6887 }
 0x485   : > { %1913 = vrot.lane.b32.xlu1 %v6888_v16, %s7222_s7  ;;  %v6890_v20 = vpop.eup %6889 }
 0x486   : > { %v6892_v22 = vpop.eup %6891  ;;  %v1896_v24 = vadd.f32 1.0, %v6890_v20 }
 0x487   : > { %v1895_v25 = vadd.f32 1.0, %v6892_v22 }
 0x488   : > { %6893 = vrcp.f32 %v1896_v24 }
 0x489   : > { %6895 = vrcp.f32 %v1895_v25 }
 0x492   : > { %v6894_v26 = vpop.eup %6893 }
 0x493   : > { %v6896_v30 = vpop.eup %6895  ;;  %v1910_v34 = vmul.f32 %v6894_v26, %v1906_v33 }
 0x494   : > { %v1909_v38 = vmul.f32 %v6896_v30, %v1905_v35 }
 0x4f5   : > { %v1916_v27 = vpop.permute.xlu0 %1915 }
 0x4f6   : > { %v1920_v28 = vmul.f32 %v6894_v26, %v1916_v27 }
 0x4f7   : > { %v1914_v31 = vpop.permute.xlu1 %1913 }
 0x4f8   : > { %1925 = vrot.lane.b32.xlu0 %v1920_v28, %s7221_s8  ;;  %v1919_v32 = vmul.f32 %v6896_v30, %v1914_v31 }
 0x4fa   : > { %1923 = vrot.lane.b32.xlu1 %v1919_v32, %s7221_s8 }
 0x56a   : > { %v1926_v36 = vpop.permute.xlu0 %1925 }
 0x56b   : > { %v7706_v37 = vadd.f32 %v1926_v36, %v1910_v34 }
 0x56c   : > { %v1924_v39 = vpop.permute.xlu1 %1923 }
 0x56d   : > { %6897 = vtanh.f32 %v7706_v37  ;;  %v7709_v40 = vadd.f32 %v1924_v39, %v1909_v38 }
 0x56f   : > { %6899 = vtanh.f32 %v7709_v40  ;;  %v2468_v25 = vrot.slane %v7709_v40, 7 }
 0x577   : > { %v6898_v41 = vpop.eup %6897 }
 0x578   : > { %1937 = vrot.lane.b32.xlu0 %v6898_v41, %s7222_s7 }
 0x579   : > { %v6900_v42 = vpop.eup %6899 }
 0x57a   : > { %1935 = vrot.lane.b32.xlu1 %v6900_v42, %s7222_s7 }
 0x5ea   : > { %v1938_v43 = vpop.permute.xlu0 %1937 }
 0x5eb   : > { %v7716_v46 = vmul.f32 %v6894_v26, %v1938_v43  ;;  %v2469_v26 = vrot.slane %v7706_v37, 7 }
 0x5ec   : > { %v1936_v44 = vpop.permute.xlu1 %1935 }
 0x5ed   : > { %v7714_v45 = vmul.f32 %v6896_v30, %v1936_v44 }
 0x5ef   : > { %v1954_v47 = vrot.slane %v7714_v45, 1 }
 0x5f1   : > { %v1955_v48 = vsel %vm1392_vm4, %v7716_v46, %v1954_v47 }
 0x5f2   : > { %1956 = vrot.lane.b32.xlu1 %v1955_v48, %s7221_s8 }
 0x664   : > { %v1957_v49 = vpop.permute.xlu1 %1956 }
 0x665   : > { %v1958_v50 = vsel %vm829_vm2, %v1957_v49, 0 }
 0x666   : > { %v2029_v52 = vand.u32 4294901760, %v1958_v50 }
 0x668   : > { %v2030_v53 = vsub.f32 %v1958_v50, %v2029_v52 }
 0x66a   : > { %v2031_v56 = vand.u32 4294901760, %v2030_v53 }
 0x66c   : > { %v2032_v57 = vsub.f32 %v2030_v53, %v2031_v56 }
 0x66e   : > { %v2033_v58 = vand.u32 4294901760, %v2032_v57 }
 0x670   : > { %5987 = vmatmul.mubr.f32.vlgmr.msra.gmra.mrb[6].mxu1 %v2033_v58 }
 0x671   : > { %6478 = vmatpush3.bf16.msra.mxu1 %v7539_v1  ;;  %5997 = vmatprep.mubr.msk.f32.mxu1 %vm7219_vm3, %v7220_v61 }
 0x672   : > { %6479 = vmatprep.subr.bf16.mxu1 %v7218_v29 }
 0x675   : > { %6481 = vmatpush3.bf16.msra.mxu1 %v7546_v4 }
 0x676   : > { %6482 = vmatprep.subr.bf16.mxu1 %v7218_v29 }
 0x678   : > { %5998 = vmatmul.mubr.f32.vlgmr.msra.gmra.mrb[6].mxu1 %v2029_v52 }
 0x679   : > { %6484 = vmatpush3.bf16.msra.mxu1 %v7559_v6  ;;  %6008 = vmatprep.mubr.msk.f32.mxu1 %vm7219_vm3, %v7220_v61 }
 0x67a   : > { %6485 = vmatprep.subr.bf16.mxu1 %v7218_v29 }
 0x67d   : > { %6487 = vmatpush3.bf16.msra.mxu1 %v7569_v7 }
 0x67e   : > { %6488 = vmatprep.subr.bf16.mxu1 %v7218_v29 }
 0x680   : > { %6009 = vmatmul.mubr.f32.vlgmr.msra.gmra.mrb[6].mxu1 %v2030_v53 }
 0x681   : > { %6490 = vmatpush3.bf16.msra.mxu1 %v7469_v21  ;;  %6019 = vmatprep.mubr.msk.f32.mxu1 %vm7219_vm3, %v7220_v61 }
 0x682   : > { %6491 = vmatprep.subr.bf16.mxu1 %v7218_v29 }
 0x685   : > { %6493 = vmatpush3.bf16.msra.mxu1 %v7520_v55 }
 0x686   : > { %6494 = vmatprep.subr.bf16.mxu1 %v7218_v29 }
 0x688   : > { %6020 = vmatmul.mubr.f32.vlgmr.msra.gmra.mrb[6].mxu1 %v2031_v56 }
 0x689   : > { %6496 = vmatpush3.bf16.msra.mxu1 %v7591_v8  ;;  %6030 = vmatprep.mubr.msk.f32.mxu1 %vm7219_vm3, %v7220_v61 }
 0x68a   : > { %6497 = vmatprep.subr.bf16.mxu1 %v7218_v29 }
 0x68d   : > { %6499 = vmatpush3.bf16.msra.mxu1 %v7604_v9 }
 0x68e   : > { %6500 = vmatprep.subr.bf16.mxu1 %v7218_v29 }
 0x690   : > { %6031 = vmatmul.mubr.f32.vlgmr.msra.gmra.mrb[6].mxu1 %v2029_v52 }
 0x691   : > { %6502 = vmatpush3.bf16.msra.mxu1 %v7469_v21  ;;  %6041 = vmatprep.mubr.msk.f32.mxu1 %vm7219_vm3, %v7220_v61 }
 0x692   : > { %6503 = vmatprep.subr.bf16.mxu1 %v7218_v29 }
 0x695   : > { %6505 = vmatpush3.bf16.msra.mxu1 %v7520_v55 }
 0x696   : > { %6542 = vmatprep.subr.bf16.mxu1 %v7218_v29 }
 0x698   : > { %6042 = vmatmul.mubr.f32.vlgmr.msra.gmra.mrb[6].mxu1 %v2029_v52 }
 0x699   : > { %6544 = vmatpush3.bf16.msra.mxu1 %v7469_v21  ;;  %6118 = vmatprep.mubr.msk.f32.mxu1 %vm7219_vm3, %v7220_v61 }
 0x69a   : > { %6545 = vmatprep.subr.bf16.mxu1 %v7218_v29 }
 0x69d   : > { %6547 = vmatpush3.bf16.msra.mxu1 %v7520_v55 }
 0x69e   : > { %6548 = vmatprep.subr.bf16.mxu1 %v7218_v29 }
 0x76b   : > { %v2441_v59 = vpop.f32.mrb[6].mxu1 }
 0x76c   : > { %v2446_v60 = vrot.slane %v2441_v59, 6  ;;  %v2447_v62 = vrot.slane %v2441_v59, 7  ;;  %v6043_v63 = vpop.f32.mrb[7].mxu1 }
 0x76e   : > { %v2450_v0 = vadd.f32 %v2446_v60, %v7638_v23  ;;  %v2451_v2 = vadd.f32 %v2447_v62, %v7635_v18 }
 0x770   : > { %6901 = vtanh.f32 %v2450_v0  ;;  %v5520_v10 = vmul.f32 -1.442695, %v2450_v0  ;;  %v5521_v11 = vmul.f32 -1.442695, %v2451_v2 }
 0x771   : > { %6903 = vtanh.f32 %v2451_v2 }
 0x772   : > { %6905 = vpow2.f32 %v5520_v10 }
 0x773   : > { %6907 = vpow2.f32 %v5521_v11 }
 0x77a   : > { %v6902_v3 = vpop.eup %6901 }
 0x77b   : > { %v6904_v5 = vpop.eup %6903  ;;  %2476 = vrot.lane.b32.xlu0 %v6902_v3, %s7222_s7 }
 0x77c   : > { %2478 = vrot.lane.b32.xlu1 %v6904_v5, %s7222_s7  ;;  %v6906_v12 = vpop.eup %6905 }
 0x77d   : > { %v6908_v13 = vpop.eup %6907  ;;  %v2458_v14 = vadd.f32 1.0, %v6906_v12 }
 0x77e   : > { %v2459_v15 = vadd.f32 1.0, %v6908_v13 }
 0x77f   : > { %6909 = vrcp.f32 %v2458_v14 }
 0x780   : > { %6911 = vrcp.f32 %v2459_v15 }
 0x789   : > { %v6910_v16 = vpop.eup %6909 }
 0x78a   : > { %v6912_v19 = vpop.eup %6911  ;;  %v2472_v27 = vmul.f32 %v6910_v16, %v2468_v25 }
 0x78b   : > { %v2473_v28 = vmul.f32 %v6912_v19, %v2469_v26 }
 0x7ed   : > { %v2477_v17 = vpop.permute.xlu0 %2476 }
 0x7ee   : > { %v2479_v20 = vpop.permute.xlu1 %2478  ;;  %v2482_v22 = vmul.f32 %v6910_v16, %v2477_v17 }
 0x7ef   : > { %v2483_v24 = vmul.f32 %v6912_v19, %v2479_v20 }
 0x7f0   : > { %2486 = vrot.lane.b32.xlu0 %v2482_v22, %s7221_s8 }
 0x7f1   : > { %2488 = vrot.lane.b32.xlu1 %v2483_v24, %s7221_s8 }
 0x862   : > { %v2487_v30 = vpop.permute.xlu0 %2486 }
 0x863   : > { %v2489_v31 = vpop.permute.xlu1 %2488  ;;  %v7767_v32 = vadd.f32 %v2487_v30, %v2472_v27 }
 0x864   : > { %v7769_v33 = vadd.f32 %v2489_v31, %v2473_v28 }
 0x865   : > { %6913 = vtanh.f32 %v7767_v32 }
 0x866   : > { %6915 = vtanh.f32 %v7769_v33  ;;  %v3033_v20 = vrot.slane %v7769_v33, 7 }
 0x86f   : > { %v6914_v34 = vpop.eup %6913 }
 0x870   : > { %v6916_v35 = vpop.eup %6915  ;;  %2498 = vrot.lane.b32.xlu0 %v6914_v34, %s7222_s7 }
 0x871   : > { %2500 = vrot.lane.b32.xlu1 %v6916_v35, %s7222_s7 }
 0x8e2   : > { %v2499_v36 = vpop.permute.xlu0 %2498 }
 0x8e3   : > { %v2501_v37 = vpop.permute.xlu1 %2500  ;;  %v7775_v38 = vmul.f32 %v6910_v16, %v2499_v36 }
 0x8e4   : > { %v7777_v39 = vmul.f32 %v6912_v19, %v2501_v37  ;;  %v3032_v19 = vrot.slane %v7767_v32, 7 }
 0x8e5   : > { %v2517_v40 = vrot.slane %v7775_v38, 2 }
 0x8e6   : > { %v2518_v41 = vrot.slane %v7777_v39, 1 }
 0x8e8   : > { %v2519_v42 = vsel %vm1392_vm4, %v2518_v41, %v2517_v40 }
 0x8e9   : > { %2520 = vrot.lane.b32.xlu0 %v2519_v42, %s7221_s8 }
 0x95b   : > { %v2521_v43 = vpop.permute.xlu0 %2520 }
 0x95c   : > { %v2522_v44 = vsel %vm829_vm2, %v2521_v43, 0 }
 0x95d   : > { %v2593_v47 = vand.u32 4294901760, %v2522_v44 }
 0x95f   : > { %v2594_v48 = vsub.f32 %v2522_v44, %v2593_v47 }
 0x961   : > { %v2595_v49 = vand.u32 4294901760, %v2594_v48 }
 0x963   : > { %v2596_v50 = vsub.f32 %v2594_v48, %v2595_v49 }
 0x965   : > { %v2597_v52 = vand.u32 4294901760, %v2596_v50 }
 0x967   : > { %6053 = vmatmul.mubr.f32.vlgmr.msra.gmra.mrb[4].mxu0 %v2597_v52 }
 0x968   : > { %6514 = vmatpush3.bf16.msra.mxu0 %v7539_v1  ;;  %6063 = vmatprep.mubr.msk.f32.mxu0 %vm7219_vm3, %v7220_v61 }
 0x969   : > { %6515 = vmatprep.subr.bf16.mxu0 %v7218_v29 }
 0x96c   : > { %6517 = vmatpush3.bf16.msra.mxu0 %v7546_v4 }
 0x96d   : > { %6518 = vmatprep.subr.bf16.mxu0 %v7218_v29 }
 0x96f   : > { %6064 = vmatmul.mubr.f32.vlgmr.msra.gmra.mrb[4].mxu0 %v2593_v47 }
 0x970   : > { %6520 = vmatpush3.bf16.msra.mxu0 %v7559_v6  ;;  %6074 = vmatprep.mubr.msk.f32.mxu0 %vm7219_vm3, %v7220_v61 }
 0x971   : > { %6521 = vmatprep.subr.bf16.mxu0 %v7218_v29 }
 0x974   : > { %6523 = vmatpush3.bf16.msra.mxu0 %v7569_v7 }
 0x975   : > { %6524 = vmatprep.subr.bf16.mxu0 %v7218_v29 }
 0x977   : > { %6075 = vmatmul.mubr.f32.vlgmr.msra.gmra.mrb[4].mxu0 %v2594_v48 }
 0x978   : > { %6526 = vmatpush3.bf16.msra.mxu0 %v7469_v21  ;;  %6085 = vmatprep.mubr.msk.f32.mxu0 %vm7219_vm3, %v7220_v61 }
 0x979   : > { %6527 = vmatprep.subr.bf16.mxu0 %v7218_v29 }
 0x97c   : > { %6529 = vmatpush3.bf16.msra.mxu0 %v7520_v55 }
 0x97d   : > { %6530 = vmatprep.subr.bf16.mxu0 %v7218_v29 }
 0x97f   : > { %6086 = vmatmul.mubr.f32.vlgmr.msra.gmra.mrb[4].mxu0 %v2595_v49 }
 0x980   : > { %6532 = vmatpush3.bf16.msra.mxu0 %v7591_v8  ;;  %6096 = vmatprep.mubr.msk.f32.mxu0 %vm7219_vm3, %v7220_v61 }
 0x981   : > { %6533 = vmatprep.subr.bf16.mxu0 %v7218_v29 }
 0x984   : > { %6535 = vmatpush3.bf16.msra.mxu0 %v7604_v9 }
 0x985   : > { %6536 = vmatprep.subr.bf16.mxu0 %v7218_v29 }
 0x987   : > { %6097 = vmatmul.mubr.f32.vlgmr.msra.gmra.mrb[4].mxu0 %v2593_v47 }
 0x988   : > { %6538 = vmatpush3.bf16.msra.mxu0 %v7469_v21  ;;  %6107 = vmatprep.mubr.msk.f32.mxu0 %vm7219_vm3, %v7220_v61 }
 0x989   : > { %6539 = vmatprep.subr.bf16.mxu0 %v7218_v29 }
 0x98c   : > { %6541 = vmatpush3.bf16.msra.mxu0 %v7520_v55 }
 0x98d   : > { %6578 = vmatprep.subr.bf16.mxu0 %v7218_v29 }
 0x98f   : > { %6108 = vmatmul.mubr.f32.vlgmr.msra.gmra.mrb[4].mxu0 %v2593_v47 }
 0x990   : > { %6580 = vmatpush3.bf16.msra.mxu0 %v7469_v21  ;;  %6184 = vmatprep.mubr.msk.f32.mxu0 %vm7219_vm3, %v7220_v61 }
 0x991   : > { %6581 = vmatprep.subr.bf16.mxu0 %v7218_v29 }
 0x994   : > { %6583 = vmatpush3.bf16.msra.mxu0 %v7520_v55 }
 0x995   : > { %6584 = vmatprep.subr.bf16.mxu0 %v7218_v29 }
 0xa62   : > { %v3005_v53 = vpop.f32.mrb[4].mxu0 }
 0xa63   : > { %v3010_v56 = vrot.slane %v3005_v53, 5  ;;  %v3011_v57 = vrot.slane %v3005_v53, 6  ;;  %v6109_v58 = vpop.f32.mrb[5].mxu0 }
 0xa65   : > { %v3014_v59 = vadd.f32 %v3010_v56, %v7638_v23  ;;  %v3015_v60 = vadd.f32 %v3011_v57, %v7635_v18 }
 0xa67   : > { %6917 = vtanh.f32 %v3014_v59  ;;  %v5522_v0 = vmul.f32 -1.442695, %v3014_v59  ;;  %v5523_v2 = vmul.f32 -1.442695, %v3015_v60 }
 0xa68   : > { %6919 = vtanh.f32 %v3015_v60 }
 0xa69   : > { %6921 = vpow2.f32 %v5522_v0 }
 0xa6a   : > { %6923 = vpow2.f32 %v5523_v2 }
 0xa71   : > { %v6918_v62 = vpop.eup %6917 }
 0xa72   : > { %v6920_v63 = vpop.eup %6919  ;;  %3040 = vrot.lane.b32.xlu1 %v6918_v62, %s7222_s7 }
 0xa73   : > { %3042 = vrot.lane.b32.xlu0 %v6920_v63, %s7222_s7  ;;  %v6922_v3 = vpop.eup %6921 }
 0xa74   : > { %v6924_v5 = vpop.eup %6923  ;;  %v3022_v10 = vadd.f32 1.0, %v6922_v3 }
 0xa75   : > { %v3023_v11 = vadd.f32 1.0, %v6924_v5 }
 0xa76   : > { %6925 = vrcp.f32 %v3022_v10 }
 0xa77   : > { %6927 = vrcp.f32 %v3023_v11 }
 0xa80   : > { %v6926_v12 = vpop.eup %6925 }
 0xa81   : > { %v6928_v14 = vpop.eup %6927  ;;  %v3036_v22 = vmul.f32 %v6926_v12, %v3032_v19 }
 0xa82   : > { %v3037_v24 = vmul.f32 %v6928_v14, %v3033_v20 }
 0xae4   : > { %v3041_v13 = vpop.permute.xlu1 %3040 }
 0xae5   : > { %v3043_v15 = vpop.permute.xlu0 %3042  ;;  %v3046_v16 = vmul.f32 %v6926_v12, %v3041_v13 }
 0xae6   : > { %v3047_v17 = vmul.f32 %v6928_v14, %v3043_v15 }
 0xae7   : > { %3050 = vrot.lane.b32.xlu1 %v3046_v16, %s7221_s8 }
 0xae8   : > { %3052 = vrot.lane.b32.xlu0 %v3047_v17, %s7221_s8 }
 0xb59   : > { %v3051_v25 = vpop.permute.xlu1 %3050 }
 0xb5a   : > { %v3053_v26 = vpop.permute.xlu0 %3052  ;;  %v7828_v27 = vadd.f32 %v3051_v25, %v3036_v22 }
 0xb5b   : > { %v7830_v28 = vadd.f32 %v3053_v26, %v3037_v24 }
 0xb5c   : > { %6929 = vtanh.f32 %v7828_v27  ;;  %v3596_v16 = vrot.slane %v7828_v27, 7 }
 0xb5d   : > { %6931 = vtanh.f32 %v7830_v28  ;;  %v3597_v17 = vrot.slane %v7830_v28, 7 }
 0xb66   : > { %v6930_v30 = vpop.eup %6929 }
 0xb67   : > { %v6932_v31 = vpop.eup %6931  ;;  %3062 = vrot.lane.b32.xlu1 %v6930_v30, %s7222_s7 }
 0xb68   : > { %3064 = vrot.lane.b32.xlu0 %v6932_v31, %s7222_s7 }
 0xbd9   : > { %v3063_v32 = vpop.permute.xlu1 %3062 }
 0xbda   : > { %v3065_v33 = vpop.permute.xlu0 %3064  ;;  %v7836_v34 = vmul.f32 %v6926_v12, %v3063_v32 }
 0xbdb   : > { %v7838_v35 = vmul.f32 %v6928_v14, %v3065_v33 }
 0xbdc   : > { %v3081_v36 = vrot.slane %v7836_v34, 3 }
 0xbdd   : > { %v3082_v37 = vrot.slane %v7838_v35, 2 }
 0xbdf   : > { %v3083_v40 = vsel %vm1392_vm4, %v3082_v37, %v3081_v36 }
 0xbe0   : > { %3084 = vrot.lane.b32.xlu1 %v3083_v40, %s7221_s8 }
 0xc52   : > { %v3085_v41 = vpop.permute.xlu1 %3084 }
 0xc53   : > { %v3086_v42 = vsel %vm829_vm2, %v3085_v41, 0 }
 0xc54   : > { %v3157_v43 = vand.u32 4294901760, %v3086_v42 }
 0xc56   : > { %v3158_v44 = vsub.f32 %v3086_v42, %v3157_v43 }
 0xc58   : > { %v3159_v47 = vand.u32 4294901760, %v3158_v44 }
 0xc5a   : > { %v3160_v48 = vsub.f32 %v3158_v44, %v3159_v47 }
 0xc5c   : > { %v3161_v49 = vand.u32 4294901760, %v3160_v48 }
 0xc5e   : > { %6119 = vmatmul.mubr.f32.vlgmr.msra.gmra.mrb[8].mxu1 %v3161_v49 }
 0xc5f   : > { %6550 = vmatpush3.bf16.msra.mxu1 %v7539_v1  ;;  %6129 = vmatprep.mubr.msk.f32.mxu1 %vm7219_vm3, %v7220_v61 }
 0xc60   : > { %6551 = vmatprep.subr.bf16.mxu1 %v7218_v29 }
 0xc63   : > { %6553 = vmatpush3.bf16.msra.mxu1 %v7546_v4 }
 0xc64   : > { %6554 = vmatprep.subr.bf16.mxu1 %v7218_v29 }
 0xc66   : > { %6130 = vmatmul.mubr.f32.vlgmr.msra.gmra.mrb[8].mxu1 %v3157_v43 }
 0xc67   : > { %6556 = vmatpush3.bf16.msra.mxu1 %v7559_v6  ;;  %6140 = vmatprep.mubr.msk.f32.mxu1 %vm7219_vm3, %v7220_v61 }
 0xc68   : > { %6557 = vmatprep.subr.bf16.mxu1 %v7218_v29 }
 0xc6b   : > { %6559 = vmatpush3.bf16.msra.mxu1 %v7569_v7 }
 0xc6c   : > { %6560 = vmatprep.subr.bf16.mxu1 %v7218_v29 }
 0xc6e   : > { %6141 = vmatmul.mubr.f32.vlgmr.msra.gmra.mrb[8].mxu1 %v3158_v44 }
 0xc6f   : > { %6562 = vmatpush3.bf16.msra.mxu1 %v7469_v21  ;;  %6151 = vmatprep.mubr.msk.f32.mxu1 %vm7219_vm3, %v7220_v61 }
 0xc70   : > { %6563 = vmatprep.subr.bf16.mxu1 %v7218_v29 }
 0xc73   : > { %6565 = vmatpush3.bf16.msra.mxu1 %v7520_v55 }
 0xc74   : > { %6566 = vmatprep.subr.bf16.mxu1 %v7218_v29 }
 0xc76   : > { %6152 = vmatmul.mubr.f32.vlgmr.msra.gmra.mrb[8].mxu1 %v3159_v47 }
 0xc77   : > { %6568 = vmatpush3.bf16.msra.mxu1 %v7591_v8  ;;  %6162 = vmatprep.mubr.msk.f32.mxu1 %vm7219_vm3, %v7220_v61 }
 0xc78   : > { %6569 = vmatprep.subr.bf16.mxu1 %v7218_v29 }
 0xc7b   : > { %6571 = vmatpush3.bf16.msra.mxu1 %v7604_v9 }
 0xc7c   : > { %6572 = vmatprep.subr.bf16.mxu1 %v7218_v29 }
 0xc7e   : > { %6163 = vmatmul.mubr.f32.vlgmr.msra.gmra.mrb[8].mxu1 %v3157_v43 }
 0xc7f   : > { %6574 = vmatpush3.bf16.msra.mxu1 %v7469_v21  ;;  %6173 = vmatprep.mubr.msk.f32.mxu1 %vm7219_vm3, %v7220_v61 }
 0xc80   : > { %6575 = vmatprep.subr.bf16.mxu1 %v7218_v29 }
 0xc83   : > { %6577 = vmatpush3.bf16.msra.mxu1 %v7520_v55 }
 0xc84   : > { %6614 = vmatprep.subr.bf16.mxu1 %v7218_v29 }
 0xc86   : > { %6174 = vmatmul.mubr.f32.vlgmr.msra.gmra.mrb[8].mxu1 %v3157_v43 }
 0xc87   : > { %6616 = vmatpush3.bf16.msra.mxu1 %v7469_v21  ;;  %6250 = vmatprep.mubr.msk.f32.mxu1 %vm7219_vm3, %v7220_v61 }
 0xc88   : > { %6617 = vmatprep.subr.bf16.mxu1 %v7218_v29 }
 0xc8b   : > { %6619 = vmatpush3.bf16.msra.mxu1 %v7520_v55 }
 0xc8c   : > { %6620 = vmatprep.subr.bf16.mxu1 %v7218_v29 }
 0xd59   : > { %v3569_v50 = vpop.f32.mrb[8].mxu1 }
 0xd5a   : > { %v3574_v52 = vrot.slane %v3569_v50, 4  ;;  %v3575_v53 = vrot.slane %v3569_v50, 5  ;;  %v6175_v56 = vpop.f32.mrb[9].mxu1 }
 0xd5c   : > { %v3578_v57 = vadd.f32 %v3574_v52, %v7638_v23  ;;  %v3579_v58 = vadd.f32 %v3575_v53, %v7635_v18 }
 0xd5e   : > { %6933 = vtanh.f32 %v3578_v57  ;;  %v5524_v62 = vmul.f32 -1.442695, %v3578_v57  ;;  %v5525_v63 = vmul.f32 -1.442695, %v3579_v58 }
 0xd5f   : > { %6935 = vtanh.f32 %v3579_v58 }
 0xd60   : > { %6937 = vpow2.f32 %v5524_v62 }
 0xd61   : > { %6939 = vpow2.f32 %v5525_v63 }
 0xd68   : > { %v6934_v59 = vpop.eup %6933 }
 0xd69   : > { %v6936_v60 = vpop.eup %6935  ;;  %3604 = vrot.lane.b32.xlu0 %v6934_v59, %s7222_s7 }
 0xd6a   : > { %3606 = vrot.lane.b32.xlu1 %v6936_v60, %s7222_s7  ;;  %v6938_v0 = vpop.eup %6937 }
 0xd6b   : > { %v6940_v2 = vpop.eup %6939  ;;  %v3586_v3 = vadd.f32 1.0, %v6938_v0 }
 0xd6c   : > { %v3587_v5 = vadd.f32 1.0, %v6940_v2 }
 0xd6d   : > { %6941 = vrcp.f32 %v3586_v3 }
 0xd6e   : > { %6943 = vrcp.f32 %v3587_v5 }
 0xd77   : > { %v6942_v10 = vpop.eup %6941 }
 0xd78   : > { %v6944_v12 = vpop.eup %6943  ;;  %v3600_v19 = vmul.f32 %v6942_v10, %v3596_v16 }
 0xd79   : > { %v3601_v20 = vmul.f32 %v6944_v12, %v3597_v17 }
 0xddb   : > { %v3605_v11 = vpop.permute.xlu0 %3604 }
 0xddc   : > { %v3607_v13 = vpop.permute.xlu1 %3606  ;;  %v3610_v14 = vmul.f32 %v6942_v10, %v3605_v11 }
 0xddd   : > { %v3611_v15 = vmul.f32 %v6944_v12, %v3607_v13 }
 0xdde   : > { %3614 = vrot.lane.b32.xlu0 %v3610_v14, %s7221_s8 }
 0xddf   : > { %3616 = vrot.lane.b32.xlu1 %v3611_v15, %s7221_s8 }
 0xe50   : > { %v3615_v22 = vpop.permute.xlu0 %3614 }
 0xe51   : > { %v3617_v24 = vpop.permute.xlu1 %3616  ;;  %v7889_v25 = vadd.f32 %v3615_v22, %v3600_v19 }
 0xe52   : > { %v7891_v26 = vadd.f32 %v3617_v24, %v3601_v20 }
 0xe53   : > { %6945 = vtanh.f32 %v7889_v25  ;;  %v4160_v16 = vrot.slane %v7889_v25, 7 }
 0xe54   : > { %6947 = vtanh.f32 %v7891_v26  ;;  %v4161_v17 = vrot.slane %v7891_v26, 7 }
 0xe5d   : > { %v6946_v30 = vpop.eup %6945 }
 0xe5e   : > { %v6948_v31 = vpop.eup %6947  ;;  %3626 = vrot.lane.b32.xlu0 %v6946_v30, %s7222_s7 }
 0xe5f   : > { %3628 = vrot.lane.b32.xlu1 %v6948_v31, %s7222_s7 }
 0xed0   : > { %v3627_v27 = vpop.permute.xlu0 %3626 }
 0xed1   : > { %v3629_v28 = vpop.permute.xlu1 %3628  ;;  %v7897_v32 = vmul.f32 %v6942_v10, %v3627_v27 }
 0xed2   : > { %v7899_v33 = vmul.f32 %v6944_v12, %v3629_v28 }
 0xed3   : > { %v3645_v36 = vrot.slane %v7897_v32, 4 }
 0xed4   : > { %v3646_v37 = vrot.slane %v7899_v33, 3 }
 0xed6   : > { %v3647_v40 = vsel %vm1392_vm4, %v3646_v37, %v3645_v36 }
 0xed7   : > { %3648 = vrot.lane.b32.xlu0 %v3647_v40, %s7221_s8 }
 0xf49   : > { %v3649_v41 = vpop.permute.xlu0 %3648 }
 0xf4a   : > { %v3650_v42 = vsel %vm829_vm2, %v3649_v41, 0 }
 0xf4b   : > { %v3721_v43 = vand.u32 4294901760, %v3650_v42 }
 0xf4d   : > { %v3722_v44 = vsub.f32 %v3650_v42, %v3721_v43 }
 0xf4f   : > { %v3723_v47 = vand.u32 4294901760, %v3722_v44 }
 0xf51   : > { %v3724_v48 = vsub.f32 %v3722_v44, %v3723_v47 }
 0xf53   : > { %v3725_v49 = vand.u32 4294901760, %v3724_v48 }
 0xf55   : > { %6185 = vmatmul.mubr.f32.vlgmr.msra.gmra.mrb[6].mxu0 %v3725_v49 }
 0xf56   : > { %6586 = vmatpush3.bf16.msra.mxu0 %v7539_v1  ;;  %6195 = vmatprep.mubr.msk.f32.mxu0 %vm7219_vm3, %v7220_v61 }
 0xf57   : > { %6587 = vmatprep.subr.bf16.mxu0 %v7218_v29 }
 0xf5a   : > { %6589 = vmatpush3.bf16.msra.mxu0 %v7546_v4 }
 0xf5b   : > { %6590 = vmatprep.subr.bf16.mxu0 %v7218_v29 }
 0xf5d   : > { %6196 = vmatmul.mubr.f32.vlgmr.msra.gmra.mrb[6].mxu0 %v3721_v43 }
 0xf5e   : > { %6592 = vmatpush3.bf16.msra.mxu0 %v7559_v6  ;;  %6206 = vmatprep.mubr.msk.f32.mxu0 %vm7219_vm3, %v7220_v61 }
 0xf5f   : > { %6593 = vmatprep.subr.bf16.mxu0 %v7218_v29 }
 0xf62   : > { %6595 = vmatpush3.bf16.msra.mxu0 %v7569_v7 }
 0xf63   : > { %6596 = vmatprep.subr.bf16.mxu0 %v7218_v29 }
 0xf65   : > { %6207 = vmatmul.mubr.f32.vlgmr.msra.gmra.mrb[6].mxu0 %v3722_v44 }
 0xf66   : > { %6598 = vmatpush3.bf16.msra.mxu0 %v7469_v21  ;;  %6217 = vmatprep.mubr.msk.f32.mxu0 %vm7219_vm3, %v7220_v61 }
 0xf67   : > { %6599 = vmatprep.subr.bf16.mxu0 %v7218_v29 }
 0xf6a   : > { %6601 = vmatpush3.bf16.msra.mxu0 %v7520_v55 }
 0xf6b   : > { %6602 = vmatprep.subr.bf16.mxu0 %v7218_v29 }
 0xf6d   : > { %6218 = vmatmul.mubr.f32.vlgmr.msra.gmra.mrb[6].mxu0 %v3723_v47 }
 0xf6e   : > { %6604 = vmatpush3.bf16.msra.mxu0 %v7591_v8  ;;  %6228 = vmatprep.mubr.msk.f32.mxu0 %vm7219_vm3, %v7220_v61 }
 0xf6f   : > { %6605 = vmatprep.subr.bf16.mxu0 %v7218_v29 }
 0xf72   : > { %6607 = vmatpush3.bf16.msra.mxu0 %v7604_v9 }
 0xf73   : > { %6608 = vmatprep.subr.bf16.mxu0 %v7218_v29 }
 0xf75   : > { %6229 = vmatmul.mubr.f32.vlgmr.msra.gmra.mrb[6].mxu0 %v3721_v43 }
 0xf76   : > { %6610 = vmatpush3.bf16.msra.mxu0 %v7469_v21  ;;  %6239 = vmatprep.mubr.msk.f32.mxu0 %vm7219_vm3, %v7220_v61 }
 0xf77   : > { %6611 = vmatprep.subr.bf16.mxu0 %v7218_v29 }
 0xf7a   : > { %6613 = vmatpush3.bf16.msra.mxu0 %v7520_v55 }
 0xf7b   : > { %6650 = vmatprep.subr.bf16.mxu0 %v7218_v29 }
 0xf7d   : > { %6240 = vmatmul.mubr.f32.vlgmr.msra.gmra.mrb[6].mxu0 %v3721_v43 }
 0xf7e   : > { %6652 = vmatpush3.bf16.msra.mxu0 %v7469_v21  ;;  %6316 = vmatprep.mubr.msk.f32.mxu0 %vm7219_vm3, %v7220_v61 }
 0xf7f   : > { %6653 = vmatprep.subr.bf16.mxu0 %v7218_v29 }
 0xf82   : > { %6655 = vmatpush3.bf16.msra.mxu0 %v7520_v55 }
 0xf83   : > { %6656 = vmatprep.subr.bf16.mxu0 %v7218_v29 }
0x1050   : > { %v4133_v50 = vpop.f32.mrb[6].mxu0 }
0x1051   : > { %v4138_v52 = vrot.slane %v4133_v50, 3  ;;  %v4139_v53 = vrot.slane %v4133_v50, 4  ;;  %v6241_v56 = vpop.f32.mrb[7].mxu0 }
0x1053   : > { %v4142_v57 = vadd.f32 %v4138_v52, %v7638_v23  ;;  %v4143_v58 = vadd.f32 %v4139_v53, %v7635_v18 }
0x1055   : > { %6949 = vtanh.f32 %v4142_v57  ;;  %v5526_v62 = vmul.f32 -1.442695, %v4142_v57  ;;  %v5527_v63 = vmul.f32 -1.442695, %v4143_v58 }
0x1056   : > { %6951 = vtanh.f32 %v4143_v58 }
0x1057   : > { %6953 = vpow2.f32 %v5526_v62 }
0x1058   : > { %6955 = vpow2.f32 %v5527_v63 }
0x105f   : > { %v6950_v59 = vpop.eup %6949 }
0x1060   : > { %v6952_v60 = vpop.eup %6951  ;;  %4168 = vrot.lane.b32.xlu1 %v6950_v59, %s7222_s7 }
0x1061   : > { %4170 = vrot.lane.b32.xlu0 %v6952_v60, %s7222_s7  ;;  %v6954_v0 = vpop.eup %6953 }
0x1062   : > { %v6956_v2 = vpop.eup %6955  ;;  %v4150_v3 = vadd.f32 1.0, %v6954_v0 }
0x1063   : > { %v4151_v5 = vadd.f32 1.0, %v6956_v2 }
0x1064   : > { %6957 = vrcp.f32 %v4150_v3 }
0x1065   : > { %6959 = vrcp.f32 %v4151_v5 }
0x106e   : > { %v6958_v10 = vpop.eup %6957 }
0x106f   : > { %v6960_v12 = vpop.eup %6959  ;;  %v4164_v19 = vmul.f32 %v6958_v10, %v4160_v16 }
0x1070   : > { %v4165_v20 = vmul.f32 %v6960_v12, %v4161_v17 }
0x10d2   : > { %v4169_v11 = vpop.permute.xlu1 %4168 }
0x10d3   : > { %v4171_v13 = vpop.permute.xlu0 %4170  ;;  %v4174_v14 = vmul.f32 %v6958_v10, %v4169_v11 }
0x10d4   : > { %v4175_v15 = vmul.f32 %v6960_v12, %v4171_v13 }
0x10d5   : > { %4178 = vrot.lane.b32.xlu1 %v4174_v14, %s7221_s8 }
0x10d6   : > { %4180 = vrot.lane.b32.xlu0 %v4175_v15, %s7221_s8 }
0x1147   : > { %v4179_v22 = vpop.permute.xlu1 %4178 }
0x1148   : > { %v4181_v24 = vpop.permute.xlu0 %4180  ;;  %v7950_v30 = vadd.f32 %v4179_v22, %v4164_v19 }
0x1149   : > { %v7952_v31 = vadd.f32 %v4181_v24, %v4165_v20 }
0x114a   : > { %6961 = vtanh.f32 %v7950_v30  ;;  %v4724_v19 = vrot.slane %v7950_v30, 7 }
0x114b   : > { %6963 = vtanh.f32 %v7952_v31  ;;  %v4725_v20 = vrot.slane %v7952_v31, 7 }
0x1154   : > { %v6962_v27 = vpop.eup %6961 }
0x1155   : > { %v6964_v28 = vpop.eup %6963  ;;  %4190 = vrot.lane.b32.xlu1 %v6962_v27, %s7222_s7 }
0x1156   : > { %4192 = vrot.lane.b32.xlu0 %v6964_v28, %s7222_s7 }
0x11c7   : > { %v4191_v25 = vpop.permute.xlu1 %4190 }
0x11c8   : > { %v4193_v26 = vpop.permute.xlu0 %4192  ;;  %v7958_v36 = vmul.f32 %v6958_v10, %v4191_v25 }
0x11c9   : > { %v7960_v37 = vmul.f32 %v6960_v12, %v4193_v26 }
0x11ca   : > { %v4209_v40 = vrot.slane %v7958_v36, 5 }
0x11cb   : > { %v4210_v41 = vrot.slane %v7960_v37, 4 }
0x11cd   : > { %v4211_v42 = vsel %vm1392_vm4, %v4210_v41, %v4209_v40 }
0x11ce   : > { %4212 = vrot.lane.b32.xlu1 %v4211_v42, %s7221_s8 }
0x1240   : > { %v4213_v43 = vpop.permute.xlu1 %4212 }
0x1241   : > { %v4214_v44 = vsel %vm829_vm2, %v4213_v43, 0 }
0x1242   : > { %v4285_v47 = vand.u32 4294901760, %v4214_v44 }
0x1244   : > { %v4286_v48 = vsub.f32 %v4214_v44, %v4285_v47 }
0x1246   : > { %v4287_v49 = vand.u32 4294901760, %v4286_v48 }
0x1248   : > { %v4288_v50 = vsub.f32 %v4286_v48, %v4287_v49 }
0x124a   : > { %v4289_v52 = vand.u32 4294901760, %v4288_v50 }
0x124c   : > { %6251 = vmatmul.mubr.f32.vlgmr.msra.gmra.mrb[10].mxu1 %v4289_v52 }
0x124d   : > { %6622 = vmatpush3.bf16.msra.mxu1 %v7539_v1  ;;  %6261 = vmatprep.mubr.msk.f32.mxu1 %vm7219_vm3, %v7220_v61 }
0x124e   : > { %6623 = vmatprep.subr.bf16.mxu1 %v7218_v29 }
0x1251   : > { %6625 = vmatpush3.bf16.msra.mxu1 %v7546_v4 }
0x1252   : > { %6626 = vmatprep.subr.bf16.mxu1 %v7218_v29 }
0x1254   : > { %6262 = vmatmul.mubr.f32.vlgmr.msra.gmra.mrb[10].mxu1 %v4285_v47 }
0x1255   : > { %6628 = vmatpush3.bf16.msra.mxu1 %v7559_v6  ;;  %6272 = vmatprep.mubr.msk.f32.mxu1 %vm7219_vm3, %v7220_v61 }
0x1256   : > { %6629 = vmatprep.subr.bf16.mxu1 %v7218_v29 }
0x1259   : > { %6631 = vmatpush3.bf16.msra.mxu1 %v7569_v7 }
0x125a   : > { %6632 = vmatprep.subr.bf16.mxu1 %v7218_v29 }
0x125c   : > { %6273 = vmatmul.mubr.f32.vlgmr.msra.gmra.mrb[10].mxu1 %v4286_v48 }
0x125d   : > { %6634 = vmatpush3.bf16.msra.mxu1 %v7469_v21  ;;  %6283 = vmatprep.mubr.msk.f32.mxu1 %vm7219_vm3, %v7220_v61 }
0x125e   : > { %6635 = vmatprep.subr.bf16.mxu1 %v7218_v29 }
0x1261   : > { %6637 = vmatpush3.bf16.msra.mxu1 %v7520_v55 }
0x1262   : > { %6638 = vmatprep.subr.bf16.mxu1 %v7218_v29 }
0x1264   : > { %6284 = vmatmul.mubr.f32.vlgmr.msra.gmra.mrb[10].mxu1 %v4287_v49 }
0x1265   : > { %6640 = vmatpush3.bf16.msra.mxu1 %v7591_v8  ;;  %6294 = vmatprep.mubr.msk.f32.mxu1 %vm7219_vm3, %v7220_v61 }
0x1266   : > { %6641 = vmatprep.subr.bf16.mxu1 %v7218_v29 }
0x1269   : > { %6643 = vmatpush3.bf16.msra.mxu1 %v7604_v9 }
0x126a   : > { %6644 = vmatprep.subr.bf16.mxu1 %v7218_v29 }
0x126c   : > { %6295 = vmatmul.mubr.f32.vlgmr.msra.gmra.mrb[10].mxu1 %v4285_v47 }
0x126d   : > { %6646 = vmatpush3.bf16.msra.mxu1 %v7469_v21  ;;  %6305 = vmatprep.mubr.msk.f32.mxu1 %vm7219_vm3, %v7220_v61 }
0x126e   : > { %6647 = vmatprep.subr.bf16.mxu1 %v7218_v29 }
0x1271   : > { %6649 = vmatpush3.bf16.msra.mxu1 %v7520_v55 }
0x1274   : > { %6306 = vmatmul.mubr.f32.vlgmr.msra.gmra.mrb[10].mxu1 %v4285_v47 }
0x1347   : > { %v4697_v53 = vpop.f32.mrb[10].mxu1 }
0x1348   : > { %v4702_v56 = vrot.slane %v4697_v53, 2  ;;  %v4703_v57 = vrot.slane %v4697_v53, 3  ;;  %v6307_v58 = vpop.f32.mrb[11].mxu1 }
0x134a   : > { %v4706_v59 = vadd.f32 %v4702_v56, %v7638_v23  ;;  %v4707_v60 = vadd.f32 %v4703_v57, %v7635_v18 }
0x134c   : > { %6965 = vtanh.f32 %v4706_v59  ;;  %v5528_v0 = vmul.f32 -1.442695, %v4706_v59  ;;  %v5529_v2 = vmul.f32 -1.442695, %v4707_v60 }
0x134d   : > { %6967 = vtanh.f32 %v4707_v60 }
0x134e   : > { %6969 = vpow2.f32 %v5528_v0 }
0x134f   : > { %6971 = vpow2.f32 %v5529_v2 }
0x1356   : > { %v6966_v62 = vpop.eup %6965 }
0x1357   : > { %v6968_v63 = vpop.eup %6967  ;;  %4732 = vrot.lane.b32.xlu0 %v6966_v62, %s7222_s7 }
0x1358   : > { %4734 = vrot.lane.b32.xlu1 %v6968_v63, %s7222_s7  ;;  %v6970_v3 = vpop.eup %6969 }
0x1359   : > { %v6972_v5 = vpop.eup %6971  ;;  %v4714_v10 = vadd.f32 1.0, %v6970_v3 }
0x135a   : > { %v4715_v11 = vadd.f32 1.0, %v6972_v5 }
0x135b   : > { %6973 = vrcp.f32 %v4714_v10 }
0x135c   : > { %6975 = vrcp.f32 %v4715_v11 }
0x1365   : > { %v6974_v12 = vpop.eup %6973 }
0x1366   : > { %v6976_v14 = vpop.eup %6975  ;;  %v4728_v22 = vmul.f32 %v6974_v12, %v4724_v19 }
0x1367   : > { %v4729_v24 = vmul.f32 %v6976_v14, %v4725_v20 }
0x13c9   : > { %v4733_v13 = vpop.permute.xlu0 %4732 }
0x13ca   : > { %v4735_v15 = vpop.permute.xlu1 %4734  ;;  %v4738_v16 = vmul.f32 %v6974_v12, %v4733_v13 }
0x13cb   : > { %v4739_v17 = vmul.f32 %v6976_v14, %v4735_v15 }
0x13cc   : > { %4742 = vrot.lane.b32.xlu0 %v4738_v16, %s7221_s8 }
0x13cd   : > { %4744 = vrot.lane.b32.xlu1 %v4739_v17, %s7221_s8 }
0x143e   : > { %v4743_v27 = vpop.permute.xlu0 %4742 }
0x143f   : > { %v4745_v28 = vpop.permute.xlu1 %4744  ;;  %v8004_v25 = vadd.f32 %v4743_v27, %v4728_v22 }
0x1440   : > { %v8006_v26 = vadd.f32 %v4745_v28, %v4729_v24 }
0x1441   : > { %6977 = vtanh.f32 %v8004_v25  ;;  %v5288_v10 = vrot.slane %v8004_v25, 7 }
0x1442   : > { %6979 = vtanh.f32 %v8006_v26  ;;  %v5289_v11 = vrot.slane %v8006_v26, 7 }
0x144b   : > { %v6978_v40 = vpop.eup %6977 }
0x144c   : > { %v6980_v41 = vpop.eup %6979  ;;  %4754 = vrot.lane.b32.xlu0 %v6978_v40, %s7222_s7 }
0x144d   : > { %4756 = vrot.lane.b32.xlu1 %v6980_v41, %s7222_s7 }
0x14be   : > { %v4755_v30 = vpop.permute.xlu0 %4754 }
0x14bf   : > { %v4757_v31 = vpop.permute.xlu1 %4756  ;;  %v8012_v42 = vmul.f32 %v6974_v12, %v4755_v30 }
0x14c0   : > { %v8014_v43 = vmul.f32 %v6976_v14, %v4757_v31 }
0x14c1   : > { %v4773_v44 = vrot.slane %v8012_v42, 6 }
0x14c2   : > { %v4774_v47 = vrot.slane %v8014_v43, 5 }
0x14c4   : > { %v4775_v48 = vsel %vm1392_vm4, %v4774_v47, %v4773_v44 }
0x14c5   : > { %4776 = vrot.lane.b32.xlu0 %v4775_v48, %s7221_s8 }
0x1537   : > { %v4777_v49 = vpop.permute.xlu0 %4776 }
0x1538   : > { %v4778_v50 = vsel %vm829_vm2, %v4777_v49, 0 }
0x1539   : > { %v4849_v52 = vand.u32 4294901760, %v4778_v50 }
0x153b   : > { %v4850_v53 = vsub.f32 %v4778_v50, %v4849_v52 }
0x153d   : > { %v4851_v56 = vand.u32 4294901760, %v4850_v53 }
0x153f   : > { %v4852_v57 = vsub.f32 %v4850_v53, %v4851_v56 }
0x1541   : > { %v4853_v58 = vand.u32 4294901760, %v4852_v57 }
0x1543   : > { %6317 = vmatmul.mubr.f32.vlgmr.msra.gmra.mrb[8].mxu0 %v4853_v58 }
0x1544   : > { %6658 = vmatpush3.bf16.msra.mxu0 %v7539_v1  ;;  %6327 = vmatprep.mubr.msk.f32.mxu0 %vm7219_vm3, %v7220_v61 }
0x1545   : > { %6659 = vmatprep.subr.bf16.mxu0 %v7218_v29 }
0x1548   : > { %6661 = vmatpush3.bf16.msra.mxu0 %v7546_v4 }
0x1549   : > { %6662 = vmatprep.subr.bf16.mxu0 %v7218_v29 }
0x154b   : > { %6328 = vmatmul.mubr.f32.vlgmr.msra.gmra.mrb[8].mxu0 %v4849_v52 }
0x154c   : > { %6664 = vmatpush3.bf16.msra.mxu0 %v7559_v6  ;;  %6338 = vmatprep.mubr.msk.f32.mxu0 %vm7219_vm3, %v7220_v61 }
0x154d   : > { %6665 = vmatprep.subr.bf16.mxu0 %v7218_v29 }
0x1550   : > { %6667 = vmatpush3.bf16.msra.mxu0 %v7569_v7 }
0x1551   : > { %6668 = vmatprep.subr.bf16.mxu0 %v7218_v29 }
0x1553   : > { %6339 = vmatmul.mubr.f32.vlgmr.msra.gmra.mrb[8].mxu0 %v4850_v53 }
0x1554   : > { %6670 = vmatpush3.bf16.msra.mxu0 %v7469_v21  ;;  %6349 = vmatprep.mubr.msk.f32.mxu0 %vm7219_vm3, %v7220_v61 }
0x1555   : > { %6671 = vmatprep.subr.bf16.mxu0 %v7218_v29 }
0x1558   : > { %6673 = vmatpush3.bf16.msra.mxu0 %v7520_v55 }
0x1559   : > { %6674 = vmatprep.subr.bf16.mxu0 %v7218_v29 }
0x155b   : > { %6350 = vmatmul.mubr.f32.vlgmr.msra.gmra.mrb[8].mxu0 %v4851_v56 }
0x155c   : > { %6676 = vmatpush3.bf16.msra.mxu0 %v7591_v8  ;;  %6360 = vmatprep.mubr.msk.f32.mxu0 %vm7219_vm3, %v7220_v61 }
0x155d   : > { %6677 = vmatprep.subr.bf16.mxu0 %v7218_v29 }
0x1560   : > { %6679 = vmatpush3.bf16.msra.mxu0 %v7604_v9 }
0x1561   : > { %6680 = vmatprep.subr.bf16.mxu0 %v7218_v29 }
0x1563   : > { %6361 = vmatmul.mubr.f32.vlgmr.msra.gmra.mrb[8].mxu0 %v4849_v52 }
0x1564   : > { %6682 = vmatpush3.bf16.msra.mxu0 %v7469_v21  ;;  %6371 = vmatprep.mubr.msk.f32.mxu0 %vm7219_vm3, %v7220_v61 }
0x1565   : > { %6683 = vmatprep.subr.bf16.mxu0 %v7218_v29 }
0x1568   : > { %6685 = vmatpush3.bf16.msra.mxu0 %v7520_v55 }
0x156b   : > { %6372 = vmatmul.mubr.f32.vlgmr.msra.gmra.mrb[8].mxu0 %v4849_v52 }
0x163e   : > { %v5261_v1 = vpop.f32.mrb[8].mxu0 }
0x163f   : > { %v5266_v4 = vrot.slane %v5261_v1, 1  ;;  %v5267_v6 = vrot.slane %v5261_v1, 2  ;;  %v6373_v7 = vpop.f32.mrb[9].mxu0 }
0x1641   : > { %v5270_v8 = vadd.f32 %v5266_v4, %v7638_v23  ;;  %v5271_v9 = vadd.f32 %v5267_v6, %v7635_v18 }
0x1643   : > { %6981 = vtanh.f32 %v5270_v8  ;;  %v5530_v29 = vmul.f32 -1.442695, %v5270_v8  ;;  %v5531_v61 = vmul.f32 -1.442695, %v5271_v9 }
0x1644   : > { %6983 = vtanh.f32 %v5271_v9 }
0x1645   : > { %6985 = vpow2.f32 %v5530_v29 }
0x1646   : > { %6987 = vpow2.f32 %v5531_v61 }
0x164d   : > { %v6982_v59 = vpop.eup %6981 }
0x164e   : > { %v6984_v21 = vpop.eup %6983  ;;  %5296 = vrot.lane.b32.xlu0 %v6982_v59, %s7222_s7 }
0x164f   : > { %5298 = vrot.lane.b32.xlu1 %v6984_v21, %s7222_s7  ;;  %v6986_v55 = vpop.eup %6985 }
0x1650   : > { %v6988_v60 = vpop.eup %6987  ;;  %v5278_v62 = vadd.f32 1.0, %v6986_v55 }
0x1651   : > { %v5279_v63 = vadd.f32 1.0, %v6988_v60 }
0x1652   : > { %6989 = vrcp.f32 %v5278_v62 }
0x1653   : > { %6991 = vrcp.f32 %v5279_v63 }
0x165c   : > { %v6990_v23 = vpop.eup %6989 }
0x165d   : > { %v6992_v0 = vpop.eup %6991  ;;  %v5292_v12 = vmul.f32 %v6990_v23, %v5288_v10 }
0x165e   : > { %v5293_v13 = vmul.f32 %v6992_v0, %v5289_v11 }
0x16c0   : > { %v5297_v18 = vpop.permute.xlu0 %5296 }
0x16c1   : > { %v5299_v2 = vpop.permute.xlu1 %5298  ;;  %v5302_v3 = vmul.f32 %v6990_v23, %v5297_v18 }
0x16c2   : > { %v5303_v5 = vmul.f32 %v6992_v0, %v5299_v2 }
0x16c3   : > { %5306 = vrot.lane.b32.xlu0 %v5302_v3, %s7221_s8 }
0x16c4   : > { %5308 = vrot.lane.b32.xlu1 %v5303_v5, %s7221_s8 }
0x1735   : > { %v5307_v14 = vpop.permute.xlu0 %5306 }
0x1736   : > { %v5309_v15 = vpop.permute.xlu1 %5308  ;;  %v5312_v16 = vadd.f32 %v5307_v14, %v5292_v12 }
0x1737   : > { %v5313_v17 = vadd.f32 %v5309_v15, %v5293_v13 }
0x1738   : > { %6993 = vtanh.f32 %v5312_v16 }
0x1739   : > { %6995 = vtanh.f32 %v5313_v17 }
0x1742   : > { %v6994_v19 = vpop.eup %6993 }
0x1743   : > { %v6996_v20 = vpop.eup %6995  ;;  %5318 = vrot.lane.b32.xlu0 %v6994_v19, %s7222_s7 }
0x1744   : > { %5320 = vrot.lane.b32.xlu1 %v6996_v20, %s7222_s7 }
0x1747   : > { %1384 = vrot.lane.b32.xlu0 %v7653_v51, %s7221_s8 }
0x1748   : > { %1382 = vrot.lane.b32.xlu1 %v7656_v54, %s7221_s8 }
0x174b   : > { %1947 = vrot.lane.b32.xlu0 %v7716_v46, %s7221_s8 }
0x174c   : > { %1945 = vrot.lane.b32.xlu1 %v7714_v45, %s7221_s8 }
0x174f   : > { %2510 = vrot.lane.b32.xlu0 %v7777_v39, %s7221_s8 }
0x1750   : > { %2508 = vrot.lane.b32.xlu1 %v7775_v38, %s7221_s8 }
0x1753   : > { %3074 = vrot.lane.b32.xlu0 %v7838_v35, %s7221_s8 }
0x1754   : > { %3072 = vrot.lane.b32.xlu1 %v7836_v34, %s7221_s8 }
0x1757   : > { %3638 = vrot.lane.b32.xlu0 %v7899_v33, %s7221_s8 }
0x1758   : > { %3636 = vrot.lane.b32.xlu1 %v7897_v32, %s7221_s8  ;;  %v5345_v32 = vrot.slane %v5313_v17, 7 }
0x175b   : > { %4202 = vrot.lane.b32.xlu0 %v7960_v37, %s7221_s8 }
0x175c   : > { %4200 = vrot.lane.b32.xlu1 %v7958_v36, %s7221_s8 }
0x175f   : > { %4766 = vrot.lane.b32.xlu0 %v8014_v43, %s7221_s8 }
0x1760   : > { %4764 = vrot.lane.b32.xlu1 %v8012_v42, %s7221_s8 }
0x17b5   : > { %v5319_v51 = vpop.permute.xlu0 %5318 }
0x17b6   : > { %v5321_v54 = vpop.permute.xlu1 %5320  ;;  %v5324_v45 = vmul.f32 %v6990_v23, %v5319_v51 }
0x17b7   : > { %v5325_v46 = vmul.f32 %v6992_v0, %v5321_v54 }
0x17b8   : > { %5328 = vrot.lane.b32.xlu1 %v5324_v45, %s7221_s8 }
0x17b9   : > { %v5337_v38 = vrot.slane %v5325_v46, 7  ;;  %v1385_v39 = vpop.permute.xlu0 %1384 }
0x17ba   : > { %v1383_v34 = vpop.permute.xlu1 %1382  ;;  %1390 = vst.msk [vmem:[%s7452_s11 + $0x8] sm:$0x1] %vm1388_vm5, %v1385_v39 }
0x17bb   : > { %1389 = vst.msk [vmem:[%s7452_s11] sm:$0x1] %vm1388_vm5, %v1383_v34  ;;  %5338 = vrot.lane.b32.xlu0 %v5337_v38, %s7221_s8 }
0x17bc   : > { %5330 = vrot.lane.b32.xlu1 %v5325_v46, %s7221_s8  ;;  %s7083_s8 = scalar_lea.vmem %s5382_s28, 32 }
0x17bd   : > { %v1948_v35 = vpop.permute.xlu0 %1947  ;;  %p7084_p8 = scmp.ne.s32.totalorder %s5382_s28, %s7083_s8  ;;  %p7091_p0 = scmp.lt.s32.totalorder %s7083_s8, %s7083_s8 }
0x17be   : > { %v1946_v33 = vpop.permute.xlu1 %1945  ;;  %1953 = vst.msk [vmem:[%s7452_s11 + $0x8] sm:$0x2] %vm1951_vm6, %v1948_v35 }
0x17bf   : > { %1952 = vst.msk [vmem:[%s7452_s11] sm:$0x2] %vm1951_vm6, %v1946_v33  ;;  %5346 = vrot.lane.b32.xlu0 %v5312_v16, %s7223_s18  ;;  %p7085_p2 = pnand %p7084_p8, %p8240_p9  ;;  %p7092_p5 = por %p7091_p0, %p7090_p7 }
0x17c0   : > { %5348 = vrot.lane.b32.xlu1 %v5345_v32, %s7223_s18 }
0x17c1   : > { %v2511_v36 = vpop.permute.xlu0 %2510  ;;  %p7086_p4 = pneg %p7085_p2 }
0x17c2   : > { %v2509_v37 = vpop.permute.xlu1 %2508  ;;  %2516 = vst.msk [vmem:[%s7452_s11 + $0x8] sm:$0x4] %vm2514_vm7, %v2511_v36 }
0x17c3   : > { %2515 = vst.msk [vmem:[%s7452_s11] sm:$0x4] %vm2514_vm7, %v2509_v37  ;;  %p7093_p11 = pnand %p7092_p5, %p7086_p4 }
0x17c5   : > { %v3075_v22 = vpop.permute.xlu0 %3074 }
0x17c6   : > { %v3073_v24 = vpop.permute.xlu1 %3072  ;;  %3080 = vst.msk [vmem:[%s7452_s11 + $0x8] sm:$0x8] %vm3078_vm8, %v3075_v22 }
0x17c7   : > { %3079 = vst.msk [vmem:[%s7452_s11] sm:$0x8] %vm3078_vm8, %v3073_v24 }
0x17c9   : > { %v3639_v27 = vpop.permute.xlu0 %3638 }
0x17ca   : > { %v3637_v28 = vpop.permute.xlu1 %3636  ;;  %3644 = vst.msk [vmem:[%s7452_s11 + $0x8] sm:$0x10] %vm3642_vm9, %v3639_v27 }
0x17cb   : > { %3643 = vst.msk [vmem:[%s7452_s11] sm:$0x10] %vm3642_vm9, %v3637_v28 }
0x17cd   : > { %v4203_v25 = vpop.permute.xlu0 %4202 }
0x17ce   : > { %v4201_v26 = vpop.permute.xlu1 %4200  ;;  %4208 = vst.msk [vmem:[%s7452_s11 + $0x8] sm:$0x20] %vm4206_vm10, %v4203_v25 }
0x17cf   : > { %4207 = vst.msk [vmem:[%s7452_s11] sm:$0x20] %vm4206_vm10, %v4201_v26 }
0x17d1   : > { %v4767_v40 = vpop.permute.xlu0 %4766 }
0x17d2   : > { %v4765_v41 = vpop.permute.xlu1 %4764  ;;  %4772 = vst.msk [vmem:[%s7452_s11 + $0x8] sm:$0x40] %vm4770_vm11, %v4767_v40 }
0x17d3   : > { %4771 = vst.msk [vmem:[%s7452_s11] sm:$0x40] %vm4770_vm11, %v4765_v41 }
0x182a   : > { %v5329_v30 = vpop.permute.xlu1 %5328 }
0x182b   : > { %5335 = vst.msk [vmem:[%s7452_s11] sm:$0x80] %vm5334_vm12, %v5329_v30  ;;  %5341 = vst.msk [vmem:[#allocation9 - $0x7] sm:$0x80] %vm5334_vm12, %v5329_v30 }
0x182d   : > { %v5339_v31 = vpop.permute.xlu0 %5338 }
0x182e   : > { %5342 = vst.msk [vmem:[#allocation9 + $0x1] sm:$0x1] %vm1388_vm5, %v5339_v31  ;;  %v5331_v42 = vpop.permute.xlu1 %5330 }
0x182f   : > { %5336 = vst.msk [vmem:[%s7452_s11 + $0x8] sm:$0x80] %vm5334_vm12, %v5331_v42 }
0x1830   : > { %7096 = shalt.err (!%p7093_p11)
}
0x1831   : > { %s7097_s7 = scalar_lea.hbm %s8214_s5, 32  ;;  %p8241_p1 = pmov %p8240_p9 }
0x1832   : > { %p7098_p12 = scmp.ne.s32.totalorder %s8214_s5, %s7097_s7  ;;  %p7103_p10 = scmp.lt.u32.totalorder %s7097_s7, %s8214_s5 }
0x1834   : > { %p7099_p6 = pnand %p7098_p12, %p8241_p1 }
0x1836   : > { %p7100_p13 = pneg %p7099_p6 }
0x1838   : > { %p7105_p3 = pnand %p7103_p10, %p7100_p13 }
0x183a   : > { %7108 = shalt.err (!%p7105_p3)
}
0x183b   : > { %p8242_p8 = pmov %p8241_p1  ;;  %s5355_s13 = scalar_lea.sflag [#allocation4], %s7440_s29 }
0x183c   : > { %s7109_s8 = scalar_lea.vmem %s8117_s15, 256  ;;  %p8243_p2 = scmp.ne.s32.totalorder %s8226_s9, 0 }
0x183d   : > { %6787 = dma.vmem_to_hbm [thread:$0]  (%p8242_p8), %s5382_s28, 32, %s8214_s5, [#allocation10]  }
0x183e   : > { %p7110_p9 = scmp.ne.s32.totalorder %s8117_s15, %s7109_s8  ;;  %s7226_s17 = smov [#allocation8]  }
0x183f   : > { %s7113_s20 = sshll.u32 %s7226_s17, 4  ;;  %s7114_s20 = int_to_ptr.vmem [resolvable:$false] %s7113_s20 }
0x1840   : > { %p7111_p4 = pnand %p7110_p9, %p8243_p2  ;;  %s7115_s7 = scalar_lea.vmem %s7114_s20, 512 }
0x1841   : > { %p7116_p0 = scmp.lt.s32.totalorder %s8117_s15, %s7114_s20  ;;  %p7117_p5 = scmp.lt.s32.totalorder %s7115_s7, %s7109_s8 }
0x1842   : > { %p7112_p7 = pneg %p7111_p4 }
0x1843   : > { %p7118_p11 = por %p7117_p5, %p7116_p0 }
0x1845   : > { %p7119_p12 = pnand %p7118_p11, %p7112_p7 }
0x1847   : > { %7122 = shalt.err (!%p7119_p12)
}
0x1848   : > { %s7123_s28 = scalar_lea.hbm %s8115_s12, 256  ;;  %s7127_s11 = scalar_lea.hbm %s8213_s4, 512 }
0x1849   : > { %p7124_p1 = scmp.ne.s32.totalorder %s8115_s12, %s7123_s28  ;;  %p7128_p10 = scmp.lt.u32.totalorder %s8115_s12, %s8213_s4 }
0x184a   : > { %p7129_p3 = scmp.lt.u32.totalorder %s7127_s11, %s7123_s28  ;;  %p7131_p9 = scmp.lt.u32.totalorder %s7123_s28, %s8115_s12 }
0x184b   : > { %p7125_p6 = pnand %p7124_p1, %p8243_p2 }
0x184c   : > { %p7130_p8 = por %p7129_p3, %p7128_p10 }
0x184d   : > { %p7126_p13 = pneg %p7125_p6 }
0x184e   : > { %p7132_p4 = por %p7131_p9, %p7130_p8 }
0x1850   : > { %p7133_p7 = pnand %p7132_p4, %p7126_p13 }
0x1852   : > { %7136 = shalt.err (!%p7133_p7)
}
0x1853   : > { %s7227_s16 = smov 128   ;;  %s7228_s8 = smov 256   ;;  %v5347_v43 = vpop.permute.xlu0 %5346  ;;  %v5349_v44 = vpop.permute.xlu1 %5348 }
0x1854   : > { %s7229_s17 = smov 8   ;;  %5352 = vst.msk [vmem:[#allocation11 - $0x7] sm:$0x80] %vm5334_vm12, %v5347_v43  ;;  %s7137_s20 = scalar_lea.vmem %s5393_s26, 32 }
0x1855   : > { %6785 = dma.vmem_to_hbm [thread:$0]  (%p8243_p2), %s8117_s15, 256, %s8115_s12, %s5355_s13, %s7227_s16, %s7228_s8, %s7229_s17   ;;  %5353 = vst.msk [vmem:[#allocation11 + $0x1] sm:$0x1] %vm1388_vm5, %v5349_v44 }
0x1856   : > { %p7138_p0 = scmp.ne.s32.totalorder %s5393_s26, %s7137_s20  ;;  %p8244_p5 = scmp.eq.s32.totalorder %s7286_s25, 1 }
0x1857   : > { %p7144_p1 = scmp.lt.s32.totalorder %s5393_s26, %s5393_s26  ;;  %p7145_p6 = scmp.lt.s32.totalorder %s7137_s20, %s7137_s20 }
0x1858   : > { %p7139_p11 = pnand %p7138_p0, %p8244_p5 }
0x1859   : > { %p7146_p13 = por %p7145_p6, %p7144_p1 }
0x185a   : > { %p7140_p12 = pneg %p7139_p11 }
0x185c   : > { %p7147_p10 = pnand %p7146_p13, %p7140_p12 }
0x185e   : > { %7150 = shalt.err (!%p7147_p10)
}
0x185f   : > { %s7151_s15 = scalar_lea.hbm %s8215_s6, 32  ;;  %p8245_p3 = pmov %p8244_p5 }
0x1860   : > { %p7152_p2 = scmp.ne.s32.totalorder %s8215_s6, %s7151_s15  ;;  %p7157_p4 = scmp.lt.u32.totalorder %s7151_s15, %s8215_s6 }
0x1862   : > { %p7153_p8 = pnand %p7152_p2, %p8245_p3 }
0x1864   : > { %p7154_p9 = pneg %p7153_p8 }
0x1866   : > { %p7159_p7 = pnand %p7157_p4, %p7154_p9 }
0x1868   : > { %7162 = shalt.err (!%p7159_p7)
}
0x1869   : > { %p8246_p0 = pmov %p8245_p3 }
0x186b   : > { %6789 = dma.vmem_to_hbm [thread:$0]  (%p8246_p0), %s5393_s26, 32, %s8215_s6, [#allocation10]  }
0x186c   : > { %p8247_p5 = pmov %p8246_p0 }
0x186d   : > { %p8248_p11 = pmov %p8246_p0 }
0x186e   : > { %7188 = dma.done.wait (%p8247_p5), [#allocation10], 64  }
0x186f   : > { %7190 = vsyncadd (%p8248_p11), [#allocation10], 4294967232 }
0x1870 PF: > { %s5412_s11 = sand.u32 1, %s7197_s21   ;;  %p8249_p12 = scmp.ne.s32.totalorder %s8227_s10, 0 }
0x1871   : > { %p8250_p1 = scmp.ge.s32.totalorder %s7209_s24, 2  ;;  %s5413_s14 = scalar_lea.sflag [#allocation4], %s5412_s11 }
0x1873   : > { %p6807_p6 = pnand %p8250_p1, %p8249_p12 }
0x1875   : > { %7192 = dma.done.wait (!%p6807_p6), %s5413_s14, 256  }
0x1876   : > { %7194 = vsyncadd (!%p6807_p6), %s5413_s14, 4294967040  ;;  %s8251_s26 = sld [smem:[#allocation16_spill]]  ;;  %p22_p13 = scmp.ge.s32.totalorder %s7290_s27, 4  }
0x1877   : > { %s8252_s21 = smov %s7201_s22  ;;  %s8253_s22 = smov %s7205_s23 }
0x1878   : > { %s8255_s24 = smov %s7290_s27  ;;  %24 = sbr.rel (!%p22_p13) target bundleno = 7 (0x7), region = 109 }
0x187c   : > { %s8254_s23 = smov %s8251_s26 }
0x187f   :  { %5418 = vsyncpa [#allocation3], 1 }
0x1880   :  { %5420 = vsyncpa [#allocation3 + $0x1], 1 }
0x1881   :  { %5421 = vsyncpa [#allocation6], 1 }
0x1882   :  { %5422 = vsyncpa [#allocation4], 1 }
0x1883   :  { %5424 = vsyncpa [#allocation4 + $0x1], 1 }
0x1884   :  { %5425 = vsyncpa [#allocation10], 1 }

</bundles_post_ra>
